<compile_context>
chip_gen: v5e
topology: v5e:2x2
jax: 0.10.0
libtpu: 0.0.40
codegen_flags: <defaults>
</compile_context>

<pallas_src>
from functools import lru_cache

import jax
import jax.numpy as jnp
from jax import lax
from jax.experimental import pallas as pl
from jax.experimental.pallas import tpu as pltpu

# ---- small synthetic sizes (consistent with the module's forward semantics) ----
S, D, H, DL = 8, 128, 256, 128      # text seq len, model dim, ffn hidden, MuLaN latent dim
Q, C, DC = 4, 64, 128               # rvq quantizers, codebook size, conditioning dim
T = 256                             # generated waveform length (per sample)
VOCAB = 64
N_SAMPLES = 2

# TODO(synk): if the placeholder audio_gen is replaced by the real multi-layer
# AudioLM stack, give the fused kernel a leading "parallel" grid axis over
# independent samples/layers so v7x's second TensorCore is used, and re-derive
# tiling / vmem_limit_bytes against v7x's 64 MiB VMEM.
_CP = pltpu.CompilerParams(dimension_semantics=("arbitrary",))


def _full_specs(args):
    # full-array blocks (everything is tiny; all resident in VMEM)
    return [pl.BlockSpec(a.shape, lambda i, n=a.ndim: (0,) * n) for a in args]


# --------------------------------------------------------------------------
# Fused kernel: text tower + residual-VQ + batched audio generation + MuLaN sim
# --------------------------------------------------------------------------
def musiclm_kernel(tok_ref, noise_ref, wq_ref, wk_ref, wv_ref, wo_ref,
                   w1_ref, w2_ref, wl_ref, cb_ref, ce_ref, wgen_ref, wa_ref,
                   music_ref, sims_ref):
    # ---- MuLaN text tower: 1 attention block + FFN + mean-pool + L2 latent ----
    x = tok_ref[...]                                                  # [S, D]
    q = jnp.dot(x, wq_ref[...], preferred_element_type=jnp.float32)
    k = jnp.dot(x, wk_ref[...], preferred_element_type=jnp.float32)
    v = jnp.dot(x, wv_ref[...], preferred_element_type=jnp.float32)
    s = jnp.dot(q, k.T, preferred_element_type=jnp.float32) * (1.0 / jnp.sqrt(jnp.float32(D)))
    s = s - jnp.max(s, axis=-1, keepdims=True)
    p = jnp.exp(s)
    p = p * pl.reciprocal(jnp.sum(p, axis=-1, keepdims=True), approx=True)
    attn = jnp.dot(p, v, preferred_element_type=jnp.float32)
    x = x + jnp.dot(attn, wo_ref[...], preferred_element_type=jnp.float32)
    h = jnp.maximum(jnp.dot(x, w1_ref[...], preferred_element_type=jnp.float32), 0.0)
    x = x + jnp.dot(h, w2_ref[...], preferred_element_type=jnp.float32)
    pooled = jnp.mean(x, axis=0, keepdims=True)                       # [1, D]
    lat = jnp.dot(pooled, wl_ref[...], preferred_element_type=jnp.float32)  # [1, DL]
    lat = lat * lax.rsqrt(jnp.sum(lat * lat, axis=-1, keepdims=True) + 1e-12)

    # ---- MuLaNEmbedQuantizer: residual-VQ. Only quant stays in the serial
    #      chain; conditioning-embed lookup is batched after the loop. ----
    residual = lat                                                    # [1, DL]
    iota = lax.broadcasted_iota(jnp.int32, (1, C), 1)
    iota_flat = lax.broadcasted_iota(jnp.int32, (1, Q * C), 1)
    onehot_flat_rows = []
    for qi in range(Q):                                               # static unroll
        cb = cb_ref[qi]                                               # [C, DL]
        # distance (constant ||residual||^2 omitted; argmin unaffected)
        d = jnp.sum(cb * cb, axis=-1)[None, :] - 2.0 * jnp.dot(
            residual, cb.T, preferred_element_type=jnp.float32)       # [1, C]
        dmin = jnp.min(d, axis=-1, keepdims=True)
        idx = jnp.min(jnp.where(d <= dmin, iota, C), axis=-1, keepdims=True)  # first argmin
        onehot = (iota == idx).astype(jnp.float32)                    # [1, C]
        quant = jnp.dot(onehot, cb, preferred_element_type=jnp.float32)
        residual = residual - quant
        onehot_flat_rows.append((iota_flat == (idx + qi * C)).astype(jnp.float32))
    onehot_flat = jnp.concatenate(onehot_flat_rows, axis=0)           # [Q, Q*C]
    ce_flat = ce_ref[...].reshape(Q * C, DC)                          # [Q*C, DC]
    text_embeds = jnp.dot(onehot_flat, ce_flat,
                          preferred_element_type=jnp.float32)         # [Q, DC]

    # ---- (simplified) AudioLM: batched conditioned generation ----
    # TODO(synk): real AudioLM is a 3-stage autoregressive transformer stack +
    #             SoundStream decoder; represented here by a single conditioned
    #             projection (matmul + tanh), now batched over all samples.
    hcond = jnp.mean(text_embeds, axis=0, keepdims=True) + noise_ref[...]   # [N, DC]
    music = jnp.tanh(jnp.dot(hcond, wgen_ref[...],
                             preferred_element_type=jnp.float32))     # [N, T]
    music_ref[...] = music

    # ---- MuLaN text<->audio cosine similarity (lane-dense [1, N] output) ----
    a = jnp.dot(music, wa_ref[...], preferred_element_type=jnp.float32)  # [N, DL]
    a = a * lax.rsqrt(jnp.sum(a * a, axis=-1, keepdims=True) + 1e-12)
    sims_ref[...] = jnp.sum(a * lat, axis=-1)[None, :]                # [1, N]


# --------------------------------------------------------------------------
# MusicLM.forward equivalent (inference only, no grad), jit'ed end-to-end.
# --------------------------------------------------------------------------
@lru_cache(maxsize=None)
def _make_forward(num_samples):
    def fwd(params, text_tokens, key):
        # TODO(synk): real code tokenizes a raw string via a BPE tokenizer; here
        #             token ids are provided directly (deterministic, in-script).
        tok_emb = jnp.take(params["tok_emb"], text_tokens.reshape(-1), axis=0)  # [S, D]
        noise = 0.1 * jax.random.normal(key, (num_samples, DC), jnp.float32)

        args = (tok_emb, noise,
                params["wq"], params["wk"], params["wv"], params["wo"],
                params["w1"], params["w2"], params["w_lat"],
                params["codebooks"], params["cond_emb"],
                params["w_gen"], params["w_audio"])

        music, sims = pl.pallas_call(
            musiclm_kernel,
            out_shape=(jax.ShapeDtypeStruct((num_samples, T), jnp.float32),
                       jax.ShapeDtypeStruct((1, num_samples), jnp.float32)),
            grid=(1,),
            in_specs=_full_specs(args),
            out_specs=(pl.BlockSpec((num_samples, T), lambda i: (0, 0)),
                       pl.BlockSpec((1, num_samples), lambda i: (0, 0))),
            compiler_params=_CP,
        )(*args)

        if num_samples == 1:
            return music                                              # [1, T]

        # on-device topk(1) selection — no host sync
        best = jnp.argmax(sims[0])
        return lax.dynamic_slice_in_dim(music, best, 1, axis=0)       # [1, T]

    return jax.jit(fwd)


def musiclm_forward(params, text_tokens, num_samples=1, key=None):
    key = jax.random.PRNGKey(0) if key is None else key
    return _make_forward(num_samples)(params, text_tokens, key)


def init_params(key):
    ks = jax.random.split(key, 12)
    f = lambda k, shape, scale=0.02: (scale * jax.random.normal(k, shape)).astype(jnp.float32)
    return dict(
        tok_emb=f(ks[0], (VOCAB, D)),
        wq=f(ks[1], (D, D)), wk=f(ks[2], (D, D)), wv=f(ks[3], (D, D)), wo=f(ks[4], (D, D)),
        w1=f(ks[5], (D, H)), w2=f(ks[6], (H, D)),
        w_lat=f(ks[7], (D, DL)),
        codebooks=f(ks[8], (Q, C, DL), 1.0),
        cond_emb=f(ks[9], (Q, C, DC), 1.0),
        w_gen=f(ks[10], (DC, T)),
        w_audio=f(ks[11], (T, DL)),
    )


if __name__ == "__main__":
    root = jax.random.PRNGKey(0)
    params = init_params(root)
    text_tokens = jax.random.randint(jax.random.fold_in(root, 99), (1, S), 0, VOCAB)

    # num_samples == 1 path (returns the single generated waveform)
    music1 = musiclm_forward(params, text_tokens, num_samples=1)
    jax.block_until_ready(music1)
    assert music1.shape == (1, T)

    # num_samples > 1 path (generate, rank by MuLaN similarity, return best)
    music_best = musiclm_forward(params, text_tokens, num_samples=N_SAMPLES)
    jax.block_until_ready(music_best)
    assert music_best.shape == (1, T)

    print("KERNEL_OK")
</pallas_src>

<mosaic_0001>
module attributes {stable_mosaic.version = 11 : i64} {
  func.func @musiclm_kernel(%arg0: i32, %arg1: memref<8x128xf32, #tpu.memory_space<vmem>>, %arg2: memref<1x128xf32, #tpu.memory_space<vmem>>, %arg3: memref<128x128xf32, #tpu.memory_space<vmem>>, %arg4: memref<128x128xf32, #tpu.memory_space<vmem>>, %arg5: memref<128x128xf32, #tpu.memory_space<vmem>>, %arg6: memref<128x128xf32, #tpu.memory_space<vmem>>, %arg7: memref<128x256xf32, #tpu.memory_space<vmem>>, %arg8: memref<256x128xf32, #tpu.memory_space<vmem>>, %arg9: memref<128x128xf32, #tpu.memory_space<vmem>>, %arg10: memref<4x64x128xf32, #tpu.memory_space<vmem>>, %arg11: memref<4x64x128xf32, #tpu.memory_space<vmem>>, %arg12: memref<128x256xf32, #tpu.memory_space<vmem>>, %arg13: memref<256x128xf32, #tpu.memory_space<vmem>>, %arg14: memref<1x256xf32, #tpu.memory_space<vmem>>, %arg15: memref<1x1xf32, #tpu.memory_space<vmem>>) attributes {dimension_semantics = [#tpu.dimension_semantics<arbitrary>], iteration_bounds = array<i64: 1>, scalar_prefetch = 0 : i64, scratch_operands = 0 : i64, tpu.core_type = #tpu.core_type<tc>, window_params = [{pipeline_mode = #tpu.pipeline_mode<synchronous>, transform_indices = @transform_0, window_bounds = array<i64: 8, 128>}, {pipeline_mode = #tpu.pipeline_mode<synchronous>, transform_indices = @transform_1, window_bounds = array<i64: 1, 128>}, {pipeline_mode = #tpu.pipeline_mode<synchronous>, transform_indices = @transform_2, window_bounds = array<i64: 128, 128>}, {pipeline_mode = #tpu.pipeline_mode<synchronous>, transform_indices = @transform_3, window_bounds = array<i64: 128, 128>}, {pipeline_mode = #tpu.pipeline_mode<synchronous>, transform_indices = @transform_4, window_bounds = array<i64: 128, 128>}, {pipeline_mode = #tpu.pipeline_mode<synchronous>, transform_indices = @transform_5, window_bounds = array<i64: 128, 128>}, {pipeline_mode = #tpu.pipeline_mode<synchronous>, transform_indices = @transform_6, window_bounds = array<i64: 128, 256>}, {pipeline_mode = #tpu.pipeline_mode<synchronous>, transform_indices = @transform_7, window_bounds = array<i64: 256, 128>}, {pipeline_mode = #tpu.pipeline_mode<synchronous>, transform_indices = @transform_8, window_bounds = array<i64: 128, 128>}, {pipeline_mode = #tpu.pipeline_mode<synchronous>, transform_indices = @transform_9, window_bounds = array<i64: 4, 64, 128>}, {pipeline_mode = #tpu.pipeline_mode<synchronous>, transform_indices = @transform_10, window_bounds = array<i64: 4, 64, 128>}, {pipeline_mode = #tpu.pipeline_mode<synchronous>, transform_indices = @transform_11, window_bounds = array<i64: 128, 256>}, {pipeline_mode = #tpu.pipeline_mode<synchronous>, transform_indices = @transform_12, window_bounds = array<i64: 256, 128>}, {pipeline_mode = #tpu.pipeline_mode<synchronous>, transform_indices = @transform_13, window_bounds = array<i64: 1, 256>}, {pipeline_mode = #tpu.pipeline_mode<synchronous>, transform_indices = @transform_14, window_bounds = array<i64: 1, 1>}]} {
    %c0 = arith.constant 0 : index
    %c0_0 = arith.constant 0 : index
    %0 = vector.load %arg1[%c0, %c0_0] : memref<8x128xf32, #tpu.memory_space<vmem>>, vector<8x128xf32>
    %c0_1 = arith.constant 0 : index
    %c0_2 = arith.constant 0 : index
    %1 = vector.load %arg3[%c0_1, %c0_2] : memref<128x128xf32, #tpu.memory_space<vmem>>, vector<128x128xf32>
    %cst = arith.constant dense<0.000000e+00> : vector<8x128xf32>
    %2 = tpu.matmul %0, %1, %cst {dimension_numbers = #tpu.dot_dimension_numbers<[1], [0], [0], [1], [0, 0, 1, 1], [], []>} : vector<8x128xf32>, vector<128x128xf32>, vector<8x128xf32> -> vector<8x128xf32>
    %c0_3 = arith.constant 0 : index
    %c0_4 = arith.constant 0 : index
    %3 = vector.load %arg4[%c0_3, %c0_4] : memref<128x128xf32, #tpu.memory_space<vmem>>, vector<128x128xf32>
    %cst_5 = arith.constant dense<0.000000e+00> : vector<8x128xf32>
    %4 = tpu.matmul %0, %3, %cst_5 {dimension_numbers = #tpu.dot_dimension_numbers<[1], [0], [0], [1], [0, 0, 1, 1], [], []>} : vector<8x128xf32>, vector<128x128xf32>, vector<8x128xf32> -> vector<8x128xf32>
    %c0_6 = arith.constant 0 : index
    %c0_7 = arith.constant 0 : index
    %5 = vector.load %arg5[%c0_6, %c0_7] : memref<128x128xf32, #tpu.memory_space<vmem>>, vector<128x128xf32>
    %cst_8 = arith.constant dense<0.000000e+00> : vector<8x128xf32>
    %6 = tpu.matmul %0, %5, %cst_8 {dimension_numbers = #tpu.dot_dimension_numbers<[1], [0], [0], [1], [0, 0, 1, 1], [], []>} : vector<8x128xf32>, vector<128x128xf32>, vector<8x128xf32> -> vector<8x128xf32>
    %7 = tpu.transpose %4, [1, 0] : vector<8x128xf32> -> vector<128x8xf32>
    %cst_9 = arith.constant dense<0.000000e+00> : vector<8x8xf32>
    %8 = tpu.matmul %2, %7, %cst_9 {dimension_numbers = #tpu.dot_dimension_numbers<[1], [0], [0], [1], [0, 0, 1, 1], [], []>} : vector<8x128xf32>, vector<128x8xf32>, vector<8x8xf32> -> vector<8x8xf32>
    %cst_10 = arith.constant 1.280000e+02 : f32
    %9 = math.sqrt %cst_10 : f32
    %cst_11 = arith.constant 1.000000e+00 : f32
    %10 = arith.divf %cst_11, %9 : f32
    %11 = vector.broadcast %10 : f32 to vector<8x8xf32>
    %12 = arith.mulf %8, %11 : vector<8x8xf32>
    %cst_12 = arith.constant dense<0xFF800000> : vector<8xf32>
    %13 = vector.multi_reduction <maximumf>, %12, %cst_12 [1] : vector<8x8xf32> to vector<8xf32>
    %14 = vector.shape_cast %13 : vector<8xf32> to vector<8x1xf32>
    %15 = vector.broadcast %14 : vector<8x1xf32> to vector<8x8xf32>
    %16 = arith.subf %12, %15 : vector<8x8xf32>
    %17 = math.exp %16 : vector<8x8xf32>
    %cst_13 = arith.constant dense<0.000000e+00> : vector<8xf32>
    %18 = vector.multi_reduction <add>, %17, %cst_13 [1] : vector<8x8xf32> to vector<8xf32>
    %19 = vector.shape_cast %18 : vector<8xf32> to vector<8x1xf32>
    %20 = tpu.reciprocal %19 {approx = true} : vector<8x1xf32> -> vector<8x1xf32>
    %21 = vector.broadcast %20 : vector<8x1xf32> to vector<8x8xf32>
    %22 = arith.mulf %17, %21 : vector<8x8xf32>
    %cst_14 = arith.constant dense<0.000000e+00> : vector<8x128xf32>
    %23 = tpu.matmul %22, %6, %cst_14 {dimension_numbers = #tpu.dot_dimension_numbers<[1], [0], [0], [1], [0, 0, 1, 1], [], []>} : vector<8x8xf32>, vector<8x128xf32>, vector<8x128xf32> -> vector<8x128xf32>
    %c0_15 = arith.constant 0 : index
    %c0_16 = arith.constant 0 : index
    %24 = vector.load %arg6[%c0_15, %c0_16] : memref<128x128xf32, #tpu.memory_space<vmem>>, vector<128x128xf32>
    %cst_17 = arith.constant dense<0.000000e+00> : vector<8x128xf32>
    %25 = tpu.matmul %23, %24, %cst_17 {dimension_numbers = #tpu.dot_dimension_numbers<[1], [0], [0], [1], [0, 0, 1, 1], [], []>} : vector<8x128xf32>, vector<128x128xf32>, vector<8x128xf32> -> vector<8x128xf32>
    %26 = arith.addf %0, %25 : vector<8x128xf32>
    %c0_18 = arith.constant 0 : index
    %c0_19 = arith.constant 0 : index
    %27 = vector.load %arg7[%c0_18, %c0_19] : memref<128x256xf32, #tpu.memory_space<vmem>>, vector<128x256xf32>
    %cst_20 = arith.constant dense<0.000000e+00> : vector<8x256xf32>
    %28 = tpu.matmul %26, %27, %cst_20 {dimension_numbers = #tpu.dot_dimension_numbers<[1], [0], [0], [1], [0, 0, 1, 1], [], []>} : vector<8x128xf32>, vector<128x256xf32>, vector<8x256xf32> -> vector<8x256xf32>
    %cst_21 = arith.constant 0.000000e+00 : f32
    %29 = vector.broadcast %cst_21 : f32 to vector<8x256xf32>
    %30 = arith.maximumf %28, %29 : vector<8x256xf32>
    %c0_22 = arith.constant 0 : index
    %c0_23 = arith.constant 0 : index
    %31 = vector.load %arg8[%c0_22, %c0_23] : memref<256x128xf32, #tpu.memory_space<vmem>>, vector<256x128xf32>
    %cst_24 = arith.constant dense<0.000000e+00> : vector<8x128xf32>
    %32 = tpu.matmul %30, %31, %cst_24 {dimension_numbers = #tpu.dot_dimension_numbers<[1], [0], [0], [1], [0, 0, 1, 1], [], []>} : vector<8x256xf32>, vector<256x128xf32>, vector<8x128xf32> -> vector<8x128xf32>
    %33 = arith.addf %26, %32 : vector<8x128xf32>
    %cst_25 = arith.constant dense<0.000000e+00> : vector<128xf32>
    %34 = vector.multi_reduction <add>, %33, %cst_25 [0] : vector<8x128xf32> to vector<128xf32>
    %35 = vector.shape_cast %34 : vector<128xf32> to vector<1x128xf32>
    %cst_26 = arith.constant 8.000000e+00 : f32
    %36 = vector.broadcast %cst_26 : f32 to vector<1x128xf32>
    %37 = arith.divf %35, %36 : vector<1x128xf32>
    %c0_27 = arith.constant 0 : index
    %c0_28 = arith.constant 0 : index
    %38 = vector.load %arg9[%c0_27, %c0_28] : memref<128x128xf32, #tpu.memory_space<vmem>>, vector<128x128xf32>
    %cst_29 = arith.constant dense<0.000000e+00> : vector<1x128xf32>
    %39 = tpu.matmul %37, %38, %cst_29 {dimension_numbers = #tpu.dot_dimension_numbers<[1], [0], [0], [1], [0, 0, 1, 1], [], []>} : vector<1x128xf32>, vector<128x128xf32>, vector<1x128xf32> -> vector<1x128xf32>
    %40 = arith.mulf %39, %39 : vector<1x128xf32>
    %cst_30 = arith.constant dense<0.000000e+00> : vector<1xf32>
    %41 = vector.multi_reduction <add>, %40, %cst_30 [1] : vector<1x128xf32> to vector<1xf32>
    %42 = vector.shape_cast %41 : vector<1xf32> to vector<1x1xf32>
    %cst_31 = arith.constant 9.99999996E-13 : f32
    %43 = vector.broadcast %cst_31 : f32 to vector<1x1xf32>
    %44 = arith.addf %42, %43 : vector<1x1xf32>
    %45 = math.rsqrt %44 : vector<1x1xf32>
    %46 = vector.broadcast %45 : vector<1x1xf32> to vector<1x128xf32>
    %47 = arith.mulf %39, %46 : vector<1x128xf32>
    %48 = tpu.iota {dimensions = array<i32: 1>} : vector<1x64xi32>
    %49 = tpu.iota {dimensions = array<i32: 1>} : vector<1x256xi32>
    %c0_32 = arith.constant 0 : index
    %c0_33 = arith.constant 0 : index
    %c0_34 = arith.constant 0 : index
    %50 = vector.load %arg10[%c0_32, %c0_33, %c0_34] : memref<4x64x128xf32, #tpu.memory_space<vmem>>, vector<1x64x128xf32>
    %51 = vector.shape_cast %50 : vector<1x64x128xf32> to vector<64x128xf32>
    %52 = arith.mulf %51, %51 : vector<64x128xf32>
    %cst_35 = arith.constant dense<0.000000e+00> : vector<64xf32>
    %53 = vector.multi_reduction <add>, %52, %cst_35 [1] : vector<64x128xf32> to vector<64xf32>
    %54 = vector.shape_cast %53 : vector<64xf32> to vector<1x64xf32>
    %55 = tpu.transpose %51, [1, 0] : vector<64x128xf32> -> vector<128x64xf32>
    %cst_36 = arith.constant dense<0.000000e+00> : vector<1x64xf32>
    %56 = tpu.matmul %47, %55, %cst_36 {dimension_numbers = #tpu.dot_dimension_numbers<[1], [0], [0], [1], [0, 0, 1, 1], [], []>} : vector<1x128xf32>, vector<128x64xf32>, vector<1x64xf32> -> vector<1x64xf32>
    %cst_37 = arith.constant 2.000000e+00 : f32
    %57 = vector.broadcast %cst_37 : f32 to vector<1x64xf32>
    %58 = arith.mulf %57, %56 : vector<1x64xf32>
    %59 = arith.subf %54, %58 : vector<1x64xf32>
    %cst_38 = arith.constant dense<0x7F800000> : vector<1xf32>
    %60 = vector.multi_reduction <minimumf>, %59, %cst_38 [1] : vector<1x64xf32> to vector<1xf32>
    %61 = vector.shape_cast %60 : vector<1xf32> to vector<1x1xf32>
    %62 = vector.broadcast %61 : vector<1x1xf32> to vector<1x64xf32>
    %63 = arith.cmpf ole, %59, %62 : vector<1x64xf32>
    %c64_i32 = arith.constant 64 : i32
    %64 = vector.broadcast %c64_i32 : i32 to vector<1x64xi32>
    %65 = arith.select %63, %48, %64 : vector<1x64xi1>, vector<1x64xi32>
    %cst_39 = arith.constant dense<2147483647> : vector<1xi32>
    %66 = vector.multi_reduction <minsi>, %65, %cst_39 [1] : vector<1x64xi32> to vector<1xi32>
    %67 = vector.shape_cast %66 : vector<1xi32> to vector<1x1xi32>
    %68 = vector.broadcast %67 : vector<1x1xi32> to vector<1x64xi32>
    %69 = arith.cmpi eq, %48, %68 : vector<1x64xi32>
    %70 = arith.extui %69 : vector<1x64xi1> to vector<1x64xi32>
    %71 = arith.sitofp %70 : vector<1x64xi32> to vector<1x64xf32>
    %cst_40 = arith.constant dense<0.000000e+00> : vector<1x128xf32>
    %72 = tpu.matmul %71, %51, %cst_40 {dimension_numbers = #tpu.dot_dimension_numbers<[1], [0], [0], [1], [0, 0, 1, 1], [], []>} : vector<1x64xf32>, vector<64x128xf32>, vector<1x128xf32> -> vector<1x128xf32>
    %73 = arith.subf %47, %72 : vector<1x128xf32>
    %c0_i32 = arith.constant 0 : i32
    %74 = vector.broadcast %c0_i32 : i32 to vector<1x1xi32>
    %75 = arith.addi %67, %74 : vector<1x1xi32>
    %76 = vector.broadcast %75 : vector<1x1xi32> to vector<1x256xi32>
    %77 = arith.cmpi eq, %49, %76 : vector<1x256xi32>
    %78 = arith.extui %77 : vector<1x256xi1> to vector<1x256xi32>
    %79 = arith.sitofp %78 : vector<1x256xi32> to vector<1x256xf32>
    %c1 = arith.constant 1 : index
    %c0_41 = arith.constant 0 : index
    %c0_42 = arith.constant 0 : index
    %80 = vector.load %arg10[%c1, %c0_41, %c0_42] : memref<4x64x128xf32, #tpu.memory_space<vmem>>, vector<1x64x128xf32>
    %81 = vector.shape_cast %80 : vector<1x64x128xf32> to vector<64x128xf32>
    %82 = arith.mulf %81, %81 : vector<64x128xf32>
    %cst_43 = arith.constant dense<0.000000e+00> : vector<64xf32>
    %83 = vector.multi_reduction <add>, %82, %cst_43 [1] : vector<64x128xf32> to vector<64xf32>
    %84 = vector.shape_cast %83 : vector<64xf32> to vector<1x64xf32>
    %85 = tpu.transpose %81, [1, 0] : vector<64x128xf32> -> vector<128x64xf32>
    %cst_44 = arith.constant dense<0.000000e+00> : vector<1x64xf32>
    %86 = tpu.matmul %73, %85, %cst_44 {dimension_numbers = #tpu.dot_dimension_numbers<[1], [0], [0], [1], [0, 0, 1, 1], [], []>} : vector<1x128xf32>, vector<128x64xf32>, vector<1x64xf32> -> vector<1x64xf32>
    %cst_45 = arith.constant 2.000000e+00 : f32
    %87 = vector.broadcast %cst_45 : f32 to vector<1x64xf32>
    %88 = arith.mulf %87, %86 : vector<1x64xf32>
    %89 = arith.subf %84, %88 : vector<1x64xf32>
    %cst_46 = arith.constant dense<0x7F800000> : vector<1xf32>
    %90 = vector.multi_reduction <minimumf>, %89, %cst_46 [1] : vector<1x64xf32> to vector<1xf32>
    %91 = vector.shape_cast %90 : vector<1xf32> to vector<1x1xf32>
    %92 = vector.broadcast %91 : vector<1x1xf32> to vector<1x64xf32>
    %93 = arith.cmpf ole, %89, %92 : vector<1x64xf32>
    %c64_i32_47 = arith.constant 64 : i32
    %94 = vector.broadcast %c64_i32_47 : i32 to vector<1x64xi32>
    %95 = arith.select %93, %48, %94 : vector<1x64xi1>, vector<1x64xi32>
    %cst_48 = arith.constant dense<2147483647> : vector<1xi32>
    %96 = vector.multi_reduction <minsi>, %95, %cst_48 [1] : vector<1x64xi32> to vector<1xi32>
    %97 = vector.shape_cast %96 : vector<1xi32> to vector<1x1xi32>
    %98 = vector.broadcast %97 : vector<1x1xi32> to vector<1x64xi32>
    %99 = arith.cmpi eq, %48, %98 : vector<1x64xi32>
    %100 = arith.extui %99 : vector<1x64xi1> to vector<1x64xi32>
    %101 = arith.sitofp %100 : vector<1x64xi32> to vector<1x64xf32>
    %cst_49 = arith.constant dense<0.000000e+00> : vector<1x128xf32>
    %102 = tpu.matmul %101, %81, %cst_49 {dimension_numbers = #tpu.dot_dimension_numbers<[1], [0], [0], [1], [0, 0, 1, 1], [], []>} : vector<1x64xf32>, vector<64x128xf32>, vector<1x128xf32> -> vector<1x128xf32>
    %103 = arith.subf %73, %102 : vector<1x128xf32>
    %c64_i32_50 = arith.constant 64 : i32
    %104 = vector.broadcast %c64_i32_50 : i32 to vector<1x1xi32>
    %105 = arith.addi %97, %104 : vector<1x1xi32>
    %106 = vector.broadcast %105 : vector<1x1xi32> to vector<1x256xi32>
    %107 = arith.cmpi eq, %49, %106 : vector<1x256xi32>
    %108 = arith.extui %107 : vector<1x256xi1> to vector<1x256xi32>
    %109 = arith.sitofp %108 : vector<1x256xi32> to vector<1x256xf32>
    %c2 = arith.constant 2 : index
    %c0_51 = arith.constant 0 : index
    %c0_52 = arith.constant 0 : index
    %110 = vector.load %arg10[%c2, %c0_51, %c0_52] : memref<4x64x128xf32, #tpu.memory_space<vmem>>, vector<1x64x128xf32>
    %111 = vector.shape_cast %110 : vector<1x64x128xf32> to vector<64x128xf32>
    %112 = arith.mulf %111, %111 : vector<64x128xf32>
    %cst_53 = arith.constant dense<0.000000e+00> : vector<64xf32>
    %113 = vector.multi_reduction <add>, %112, %cst_53 [1] : vector<64x128xf32> to vector<64xf32>
    %114 = vector.shape_cast %113 : vector<64xf32> to vector<1x64xf32>
    %115 = tpu.transpose %111, [1, 0] : vector<64x128xf32> -> vector<128x64xf32>
    %cst_54 = arith.constant dense<0.000000e+00> : vector<1x64xf32>
    %116 = tpu.matmul %103, %115, %cst_54 {dimension_numbers = #tpu.dot_dimension_numbers<[1], [0], [0], [1], [0, 0, 1, 1], [], []>} : vector<1x128xf32>, vector<128x64xf32>, vector<1x64xf32> -> vector<1x64xf32>
    %cst_55 = arith.constant 2.000000e+00 : f32
    %117 = vector.broadcast %cst_55 : f32 to vector<1x64xf32>
    %118 = arith.mulf %117, %116 : vector<1x64xf32>
    %119 = arith.subf %114, %118 : vector<1x64xf32>
    %cst_56 = arith.constant dense<0x7F800000> : vector<1xf32>
    %120 = vector.multi_reduction <minimumf>, %119, %cst_56 [1] : vector<1x64xf32> to vector<1xf32>
    %121 = vector.shape_cast %120 : vector<1xf32> to vector<1x1xf32>
    %122 = vector.broadcast %121 : vector<1x1xf32> to vector<1x64xf32>
    %123 = arith.cmpf ole, %119, %122 : vector<1x64xf32>
    %c64_i32_57 = arith.constant 64 : i32
    %124 = vector.broadcast %c64_i32_57 : i32 to vector<1x64xi32>
    %125 = arith.select %123, %48, %124 : vector<1x64xi1>, vector<1x64xi32>
    %cst_58 = arith.constant dense<2147483647> : vector<1xi32>
    %126 = vector.multi_reduction <minsi>, %125, %cst_58 [1] : vector<1x64xi32> to vector<1xi32>
    %127 = vector.shape_cast %126 : vector<1xi32> to vector<1x1xi32>
    %128 = vector.broadcast %127 : vector<1x1xi32> to vector<1x64xi32>
    %129 = arith.cmpi eq, %48, %128 : vector<1x64xi32>
    %130 = arith.extui %129 : vector<1x64xi1> to vector<1x64xi32>
    %131 = arith.sitofp %130 : vector<1x64xi32> to vector<1x64xf32>
    %cst_59 = arith.constant dense<0.000000e+00> : vector<1x128xf32>
    %132 = tpu.matmul %131, %111, %cst_59 {dimension_numbers = #tpu.dot_dimension_numbers<[1], [0], [0], [1], [0, 0, 1, 1], [], []>} : vector<1x64xf32>, vector<64x128xf32>, vector<1x128xf32> -> vector<1x128xf32>
    %133 = arith.subf %103, %132 : vector<1x128xf32>
    %c128_i32 = arith.constant 128 : i32
    %134 = vector.broadcast %c128_i32 : i32 to vector<1x1xi32>
    %135 = arith.addi %127, %134 : vector<1x1xi32>
    %136 = vector.broadcast %135 : vector<1x1xi32> to vector<1x256xi32>
    %137 = arith.cmpi eq, %49, %136 : vector<1x256xi32>
    %138 = arith.extui %137 : vector<1x256xi1> to vector<1x256xi32>
    %139 = arith.sitofp %138 : vector<1x256xi32> to vector<1x256xf32>
    %c3 = arith.constant 3 : index
    %c0_60 = arith.constant 0 : index
    %c0_61 = arith.constant 0 : index
    %140 = vector.load %arg10[%c3, %c0_60, %c0_61] : memref<4x64x128xf32, #tpu.memory_space<vmem>>, vector<1x64x128xf32>
    %141 = vector.shape_cast %140 : vector<1x64x128xf32> to vector<64x128xf32>
    %142 = arith.mulf %141, %141 : vector<64x128xf32>
    %cst_62 = arith.constant dense<0.000000e+00> : vector<64xf32>
    %143 = vector.multi_reduction <add>, %142, %cst_62 [1] : vector<64x128xf32> to vector<64xf32>
    %144 = vector.shape_cast %143 : vector<64xf32> to vector<1x64xf32>
    %145 = tpu.transpose %141, [1, 0] : vector<64x128xf32> -> vector<128x64xf32>
    %cst_63 = arith.constant dense<0.000000e+00> : vector<1x64xf32>
    %146 = tpu.matmul %133, %145, %cst_63 {dimension_numbers = #tpu.dot_dimension_numbers<[1], [0], [0], [1], [0, 0, 1, 1], [], []>} : vector<1x128xf32>, vector<128x64xf32>, vector<1x64xf32> -> vector<1x64xf32>
    %cst_64 = arith.constant 2.000000e+00 : f32
    %147 = vector.broadcast %cst_64 : f32 to vector<1x64xf32>
    %148 = arith.mulf %147, %146 : vector<1x64xf32>
    %149 = arith.subf %144, %148 : vector<1x64xf32>
    %cst_65 = arith.constant dense<0x7F800000> : vector<1xf32>
    %150 = vector.multi_reduction <minimumf>, %149, %cst_65 [1] : vector<1x64xf32> to vector<1xf32>
    %151 = vector.shape_cast %150 : vector<1xf32> to vector<1x1xf32>
    %152 = vector.broadcast %151 : vector<1x1xf32> to vector<1x64xf32>
    %153 = arith.cmpf ole, %149, %152 : vector<1x64xf32>
    %c64_i32_66 = arith.constant 64 : i32
    %154 = vector.broadcast %c64_i32_66 : i32 to vector<1x64xi32>
    %155 = arith.select %153, %48, %154 : vector<1x64xi1>, vector<1x64xi32>
    %cst_67 = arith.constant dense<2147483647> : vector<1xi32>
    %156 = vector.multi_reduction <minsi>, %155, %cst_67 [1] : vector<1x64xi32> to vector<1xi32>
    %157 = vector.shape_cast %156 : vector<1xi32> to vector<1x1xi32>
    %c192_i32 = arith.constant 192 : i32
    %158 = vector.broadcast %c192_i32 : i32 to vector<1x1xi32>
    %159 = arith.addi %157, %158 : vector<1x1xi32>
    %160 = vector.broadcast %159 : vector<1x1xi32> to vector<1x256xi32>
    %161 = arith.cmpi eq, %49, %160 : vector<1x256xi32>
    %162 = arith.extui %161 : vector<1x256xi1> to vector<1x256xi32>
    %163 = arith.sitofp %162 : vector<1x256xi32> to vector<1x256xf32>
    %164 = tpu.concatenate %79, %109, %139, %163 in 0 : vector<1x256xf32>, vector<1x256xf32>, vector<1x256xf32>, vector<1x256xf32> -> vector<4x256xf32>
    %c0_68 = arith.constant 0 : index
    %c0_69 = arith.constant 0 : index
    %c0_70 = arith.constant 0 : index
    %165 = vector.load %arg11[%c0_68, %c0_69, %c0_70] : memref<4x64x128xf32, #tpu.memory_space<vmem>>, vector<4x64x128xf32>
    %166 = vector.shape_cast %165 : vector<4x64x128xf32> to vector<256x128xf32>
    %cst_71 = arith.constant dense<0.000000e+00> : vector<4x128xf32>
    %167 = tpu.matmul %164, %166, %cst_71 {dimension_numbers = #tpu.dot_dimension_numbers<[1], [0], [0], [1], [0, 0, 1, 1], [], []>} : vector<4x256xf32>, vector<256x128xf32>, vector<4x128xf32> -> vector<4x128xf32>
    %cst_72 = arith.constant dense<0.000000e+00> : vector<128xf32>
    %168 = vector.multi_reduction <add>, %167, %cst_72 [0] : vector<4x128xf32> to vector<128xf32>
    %169 = vector.shape_cast %168 : vector<128xf32> to vector<1x128xf32>
    %cst_73 = arith.constant 4.000000e+00 : f32
    %170 = vector.broadcast %cst_73 : f32 to vector<1x128xf32>
    %171 = arith.divf %169, %170 : vector<1x128xf32>
    %c0_74 = arith.constant 0 : index
    %c0_75 = arith.constant 0 : index
    %172 = vector.load %arg2[%c0_74, %c0_75] : memref<1x128xf32, #tpu.memory_space<vmem>>, vector<1x128xf32>
    %173 = arith.addf %171, %172 : vector<1x128xf32>
    %c0_76 = arith.constant 0 : index
    %c0_77 = arith.constant 0 : index
    %174 = vector.load %arg12[%c0_76, %c0_77] : memref<128x256xf32, #tpu.memory_space<vmem>>, vector<128x256xf32>
    %cst_78 = arith.constant dense<0.000000e+00> : vector<1x256xf32>
    %175 = tpu.matmul %173, %174, %cst_78 {dimension_numbers = #tpu.dot_dimension_numbers<[1], [0], [0], [1], [0, 0, 1, 1], [], []>} : vector<1x128xf32>, vector<128x256xf32>, vector<1x256xf32> -> vector<1x256xf32>
    %176 = math.tanh %175 : vector<1x256xf32>
    %c0_79 = arith.constant 0 : index
    %c0_80 = arith.constant 0 : index
    %177 = vector.load %arg14[%c0_79, %c0_80] : memref<1x256xf32, #tpu.memory_space<vmem>>, vector<1x256xf32>
    tpu.vector_store %arg14[%c0_79, %c0_80], %176 {strides = array<i32>} : memref<1x256xf32, #tpu.memory_space<vmem>>, vector<1x256xf32>,
    %c0_81 = arith.constant 0 : index
    %c0_82 = arith.constant 0 : index
    %178 = vector.load %arg13[%c0_81, %c0_82] : memref<256x128xf32, #tpu.memory_space<vmem>>, vector<256x128xf32>
    %cst_83 = arith.constant dense<0.000000e+00> : vector<1x128xf32>
    %179 = tpu.matmul %176, %178, %cst_83 {dimension_numbers = #tpu.dot_dimension_numbers<[1], [0], [0], [1], [0, 0, 1, 1], [], []>} : vector<1x256xf32>, vector<256x128xf32>, vector<1x128xf32> -> vector<1x128xf32>
    %180 = arith.mulf %179, %179 : vector<1x128xf32>
    %cst_84 = arith.constant dense<0.000000e+00> : vector<1xf32>
    %181 = vector.multi_reduction <add>, %180, %cst_84 [1] : vector<1x128xf32> to vector<1xf32>
    %182 = vector.shape_cast %181 : vector<1xf32> to vector<1x1xf32>
    %cst_85 = arith.constant 9.99999996E-13 : f32
    %183 = vector.broadcast %cst_85 : f32 to vector<1x1xf32>
    %184 = arith.addf %182, %183 : vector<1x1xf32>
    %185 = math.rsqrt %184 : vector<1x1xf32>
    %186 = vector.broadcast %185 : vector<1x1xf32> to vector<1x128xf32>
    %187 = arith.mulf %179, %186 : vector<1x128xf32>
    %188 = arith.mulf %187, %47 : vector<1x128xf32>
    %cst_86 = arith.constant dense<0.000000e+00> : vector<1xf32>
    %189 = vector.multi_reduction <add>, %188, %cst_86 [1] : vector<1x128xf32> to vector<1xf32>
    %190 = vector.shape_cast %189 : vector<1xf32> to vector<1x1xf32>
    %c0_87 = arith.constant 0 : index
    %c0_88 = arith.constant 0 : index
    %191 = vector.load %arg15[%c0_87, %c0_88] : memref<1x1xf32, #tpu.memory_space<vmem>>, vector<1x1xf32>
    tpu.vector_store %arg15[%c0_87, %c0_88], %190 {strides = array<i32>} : memref<1x1xf32, #tpu.memory_space<vmem>>, vector<1x1xf32>,
    return
  }
  func.func @transform_0(%arg0: i32) -> (i32, i32) {
    %c0_i32 = arith.constant 0 : i32
    %c0_i32_0 = arith.constant 0 : i32
    %c0_i32_1 = arith.constant 0 : i32
    return %c0_i32, %c0_i32_0 : i32, i32
  }
  func.func @transform_1(%arg0: i32) -> (i32, i32) {
    %c0_i32 = arith.constant 0 : i32
    %c0_i32_0 = arith.constant 0 : i32
    %c0_i32_1 = arith.constant 0 : i32
    return %c0_i32, %c0_i32_0 : i32, i32
  }
  func.func @transform_2(%arg0: i32) -> (i32, i32) {
    %c0_i32 = arith.constant 0 : i32
    %c0_i32_0 = arith.constant 0 : i32
    %c0_i32_1 = arith.constant 0 : i32
    return %c0_i32, %c0_i32_0 : i32, i32
  }
  func.func @transform_3(%arg0: i32) -> (i32, i32) {
    %c0_i32 = arith.constant 0 : i32
    %c0_i32_0 = arith.constant 0 : i32
    %c0_i32_1 = arith.constant 0 : i32
    return %c0_i32, %c0_i32_0 : i32, i32
  }
  func.func @transform_4(%arg0: i32) -> (i32, i32) {
    %c0_i32 = arith.constant 0 : i32
    %c0_i32_0 = arith.constant 0 : i32
    %c0_i32_1 = arith.constant 0 : i32
    return %c0_i32, %c0_i32_0 : i32, i32
  }
  func.func @transform_5(%arg0: i32) -> (i32, i32) {
    %c0_i32 = arith.constant 0 : i32
    %c0_i32_0 = arith.constant 0 : i32
    %c0_i32_1 = arith.constant 0 : i32
    return %c0_i32, %c0_i32_0 : i32, i32
  }
  func.func @transform_6(%arg0: i32) -> (i32, i32) {
    %c0_i32 = arith.constant 0 : i32
    %c0_i32_0 = arith.constant 0 : i32
    %c0_i32_1 = arith.constant 0 : i32
    return %c0_i32, %c0_i32_0 : i32, i32
  }
  func.func @transform_7(%arg0: i32) -> (i32, i32) {
    %c0_i32 = arith.constant 0 : i32
    %c0_i32_0 = arith.constant 0 : i32
    %c0_i32_1 = arith.constant 0 : i32
    return %c0_i32, %c0_i32_0 : i32, i32
  }
  func.func @transform_8(%arg0: i32) -> (i32, i32) {
    %c0_i32 = arith.constant 0 : i32
    %c0_i32_0 = arith.constant 0 : i32
    %c0_i32_1 = arith.constant 0 : i32
    return %c0_i32, %c0_i32_0 : i32, i32
  }
  func.func @transform_9(%arg0: i32) -> (i32, i32, i32) {
    %c0_i32 = arith.constant 0 : i32
    %c0_i32_0 = arith.constant 0 : i32
    %c0_i32_1 = arith.constant 0 : i32
    %c0_i32_2 = arith.constant 0 : i32
    return %c0_i32, %c0_i32_0, %c0_i32_1 : i32, i32, i32
  }
  func.func @transform_10(%arg0: i32) -> (i32, i32, i32) {
    %c0_i32 = arith.constant 0 : i32
    %c0_i32_0 = arith.constant 0 : i32
    %c0_i32_1 = arith.constant 0 : i32
    %c0_i32_2 = arith.constant 0 : i32
    return %c0_i32, %c0_i32_0, %c0_i32_1 : i32, i32, i32
  }
  func.func @transform_11(%arg0: i32) -> (i32, i32) {
    %c0_i32 = arith.constant 0 : i32
    %c0_i32_0 = arith.constant 0 : i32
    %c0_i32_1 = arith.constant 0 : i32
    return %c0_i32, %c0_i32_0 : i32, i32
  }
  func.func @transform_12(%arg0: i32) -> (i32, i32) {
    %c0_i32 = arith.constant 0 : i32
    %c0_i32_0 = arith.constant 0 : i32
    %c0_i32_1 = arith.constant 0 : i32
    return %c0_i32, %c0_i32_0 : i32, i32
  }
  func.func @transform_13(%arg0: i32) -> (i32, i32) {
    %c0_i32 = arith.constant 0 : i32
    %c0_i32_0 = arith.constant 0 : i32
    %c0_i32_1 = arith.constant 0 : i32
    return %c0_i32, %c0_i32_0 : i32, i32
  }
  func.func @transform_14(%arg0: i32) -> (i32, i32) {
    %c0_i32 = arith.constant 0 : i32
    %c0_i32_0 = arith.constant 0 : i32
    %c0_i32_1 = arith.constant 0 : i32
    return %c0_i32, %c0_i32_0 : i32, i32
  }
}

</mosaic_0001>

<bundles_post_ra>
// kernel: fwd.1
= control target key start
LH: loop header
LB: loop body
LE: loop exit
PB: predicated region body
PF: predicated region fallthrough
CT: control target
= control target key end

     0   :  { %20 = vsyncpa [#allocation3], 0  ;;  %s2757_s0 = inlined_call_operand.vmem [shape: f32[8,128], index: 0, kind: input, shape index: {}]   ;;  %s2758_s1 = inlined_call_operand.vmem [shape: f32[1,128], index: 1, kind: input, shape index: {}]   ;;  %s2759_s2 = inlined_call_operand.hbm [shape: f32[128,128], index: 2, kind: input, shape index: {}]   ;;  %s2760_s3 = inlined_call_operand.hbm [shape: f32[128,128], index: 3, kind: input, shape index: {}]   ;;  %s2761_s4 = inlined_call_operand.hbm [shape: f32[128,128], index: 4, kind: input, shape index: {}]   ;;  %s2762_s5 = inlined_call_operand.hbm [shape: f32[128,128], index: 5, kind: input, shape index: {}]   ;;  %s2763_s6 = inlined_call_operand.hbm [shape: f32[128,256], index: 6, kind: input, shape index: {}]   ;;  %s2764_s7 = inlined_call_operand.hbm [shape: f32[256,128], index: 7, kind: input, shape index: {}]   ;;  %s2765_s8 = inlined_call_operand.hbm [shape: f32[128,128], index: 8, kind: input, shape index: {}]   ;;  %s2766_s9 = inlined_call_operand.hbm [shape: f32[4,64,128], index: 9, kind: input, shape index: {}]   ;;  %s2767_s10 = inlined_call_operand.hbm [shape: f32[4,64,128], index: 10, kind: input, shape index: {}]   ;;  %s2768_s11 = inlined_call_operand.hbm [shape: f32[128,256], index: 11, kind: input, shape index: {}]   ;;  %s2769_s12 = inlined_call_operand.hbm [shape: f32[256,128], index: 12, kind: input, shape index: {}]   ;;  %s2770_s13 = inlined_call_operand.hbm [shape: f32[1,256], index: 13, kind: output, shape index: {0}]   ;;  %s2771_s14 = inlined_call_operand.hbm [shape: f32[1,1], index: 14, kind: output, shape index: {1}]  }
   0x1   :  { %21 = vsyncpa [#allocation6], 0 }
   0x2   :  { %22 = vsyncpa [#allocation9], 0 }
   0x3   :  { %23 = vsyncpa [#allocation12], 0 }
   0x4   :  { %24 = vsyncpa [#allocation15], 0 }
   0x5   :  { %25 = vsyncpa [#allocation18], 0 }
   0x6   :  { %26 = vsyncpa [#allocation4], 0 }
   0x7   :  { %27 = vsyncpa [#allocation22], 0  ;;  %s49_s15 = sshll.u32 %s2760_s3, 4  ;;  %s2324_s16 = smov [#allocation5]   ;;  %s50_s15 = int_to_ptr.hbm [resolvable:$true] %s49_s15 }
   0x8   :  { %s51_s17 = sshll.u32 %s2324_s16, 4  ;;  %s75_s20 = sshll.u32 %s2762_s5, 4  ;;  %s52_s17 = int_to_ptr.vmem [resolvable:$true] %s51_s17  ;;  %s76_s20 = int_to_ptr.hbm [resolvable:$true] %s75_s20 }
   0x9   :  { %s2325_s21 = smov 128   ;;  %s2326_s22 = smov 8  }
   0xa   :  { %57 = dma.hbm_to_vmem [thread:$0]  %s50_s15, 2048, %s52_s17, [#allocation6], %s2325_s21, %s2325_s21, %s2326_s22  }
   0xb   :  { %s2327_s23 = smov [#allocation8]   ;;  %s101_s3 = sshll.u32 %s2764_s7, 4  ;;  %s102_s3 = int_to_ptr.hbm [resolvable:$true] %s101_s3 }
   0xc   :  { %s77_s24 = sshll.u32 %s2327_s23, 4  ;;  %s127_s28 = sshll.u32 %s2766_s9, 4  ;;  %s78_s24 = int_to_ptr.vmem [resolvable:$true] %s77_s24  ;;  %s128_s28 = int_to_ptr.hbm [resolvable:$true] %s127_s28 }
   0xd   :  { %83 = dma.hbm_to_vmem [thread:$0]  %s76_s20, 2048, %s78_s24, [#allocation9], %s2325_s21, %s2325_s21, %s2326_s22  }
   0xe   :  { %s2328_s29 = smov [#allocation11]   ;;  %s2329_s15 = smov [#allocation14]  }
   0xf   :  { %s103_s30 = sshll.u32 %s2328_s29, 4  ;;  %s129_s7 = sshll.u32 %s2329_s15, 4  ;;  %s104_s30 = int_to_ptr.vmem [resolvable:$true] %s103_s30  ;;  %s130_s7 = int_to_ptr.vmem [resolvable:$true] %s129_s7 }
  0x10   :  { %109 = dma.hbm_to_vmem [thread:$0]  %s102_s3, 4096, %s104_s30, [#allocation12], %s2325_s21, %s2325_s21, %s2326_s22  }
  0x11   :  { %135 = dma.hbm_to_vmem [thread:$0]  %s128_s28, 4096, %s130_s7, [#allocation15], %s2325_s21, %s2325_s21, %s2326_s22  }
  0x12   :  { %s153_s18 = sshll.u32 %s2768_s11, 4  ;;  %s2330_s9 = smov [#allocation17]   ;;  %s154_s18 = int_to_ptr.hbm [resolvable:$true] %s153_s18 }
  0x13   :  { %s155_s19 = sshll.u32 %s2330_s9, 4  ;;  %s36_s24 = sshll.u32 %s2759_s2, 4  ;;  %s156_s19 = int_to_ptr.vmem [resolvable:$true] %s155_s19  ;;  %s37_s24 = int_to_ptr.hbm [resolvable:$true] %s36_s24 }
  0x14   :  { %s2331_s25 = smov 256   ;;  %s2332_s26 = smov 16  }
  0x15   :  { %161 = dma.hbm_to_vmem [thread:$0]  %s154_s18, 4096, %s156_s19, [#allocation18], %s2331_s25, %s2331_s25, %s2332_s26  }
  0x16   :  { %s2333_s3 = smov [#allocation2]   ;;  %s62_s29 = sshll.u32 %s2761_s4, 4  ;;  %s63_s29 = int_to_ptr.hbm [resolvable:$true] %s62_s29 }
  0x17   :  { %s38_s5 = sshll.u32 %s2333_s3, 4  ;;  %s88_s2 = sshll.u32 %s2763_s6, 4  ;;  %s39_s5 = int_to_ptr.vmem [resolvable:$true] %s38_s5  ;;  %s89_s2 = int_to_ptr.hbm [resolvable:$true] %s88_s2 }
  0x18   :  { %44 = dma.hbm_to_vmem [thread:$0]  %s37_s24, 2048, %s39_s5, [#allocation3], %s2325_s21, %s2325_s21, %s2326_s22  }
  0x19   :  { %s2334_s15 = smov [#allocation7]   ;;  %s2335_s16 = smov [#allocation10]  }
  0x1a   :  { %s64_s7 = sshll.u32 %s2334_s15, 4  ;;  %s90_s4 = sshll.u32 %s2335_s16, 4  ;;  %s65_s7 = int_to_ptr.vmem [resolvable:$true] %s64_s7  ;;  %s91_s4 = int_to_ptr.vmem [resolvable:$true] %s90_s4 }
  0x1b   :  { %70 = dma.hbm_to_vmem [thread:$0]  %s63_s29, 2048, %s65_s7, [#allocation6], %s2325_s21, %s2325_s21, %s2326_s22  }
  0x1c   :  { %s114_s9 = sshll.u32 %s2765_s8, 4  ;;  %s140_s6 = sshll.u32 %s2767_s10, 4  ;;  %s115_s9 = int_to_ptr.hbm [resolvable:$true] %s114_s9  ;;  %s141_s6 = int_to_ptr.hbm [resolvable:$true] %s140_s6 }
  0x1d   :  { %96 = dma.hbm_to_vmem [thread:$0]  %s89_s2, 4096, %s91_s4, [#allocation9], %s2331_s25, %s2331_s25, %s2332_s26  }
  0x1e   :  { %s2336_s23 = smov [#allocation13]   ;;  %s2337_s3 = smov [#allocation16]  }
  0x1f   :  { %s116_s24 = sshll.u32 %s2336_s23, 4  ;;  %s142_s5 = sshll.u32 %s2337_s3, 4  ;;  %s117_s24 = int_to_ptr.vmem [resolvable:$true] %s116_s24  ;;  %s143_s5 = int_to_ptr.vmem [resolvable:$true] %s142_s5 }
  0x20   :  { %122 = dma.hbm_to_vmem [thread:$0]  %s115_s9, 2048, %s117_s24, [#allocation12], %s2325_s21, %s2325_s21, %s2326_s22  }
  0x21   :  { %s166_s8 = sshll.u32 %s2769_s12, 4  ;;  %s2338_s10 = smov [#allocation19]   ;;  %s167_s8 = int_to_ptr.hbm [resolvable:$true] %s166_s8 }
  0x22   :  { %148 = dma.hbm_to_vmem [thread:$0]  %s141_s6, 4096, %s143_s5, [#allocation15], %s2325_s21, %s2325_s21, %s2326_s22  }
  0x23   :  { %s168_s25 = sshll.u32 %s2338_s10, 4  ;;  %s169_s25 = int_to_ptr.vmem [resolvable:$true] %s168_s25 }
  0x24   :  { %174 = dma.hbm_to_vmem [thread:$0]  %s167_s8, 4096, %s169_s25, [#allocation18], %s2325_s21, %s2325_s21, %s2326_s22  }
  0x25   :  { %2308 = dma.done.wait [#allocation3], 2048  }
  0x26   :  { %2309 = vsyncadd [#allocation3], 4294965248 }
  0x27   :  { %2310 = dma.done.wait [#allocation6], 4096  }
  0x28   :  { %2311 = vsyncadd [#allocation6], 4294963200 }
  0x29   :  { %2312 = dma.done.wait [#allocation9], 6144  }
  0x2a   :  { %2313 = vsyncadd [#allocation9], 4294961152 }
  0x2b   :  { %2314 = dma.done.wait [#allocation12], 6144  }
  0x2c   :  { %2315 = vsyncadd [#allocation12], 4294961152 }
  0x2d   :  { %2316 = dma.done.wait [#allocation15], 8192  }
  0x2e   :  { %2317 = vsyncadd [#allocation15], 4294959104 }
  0x2f   :  { %2318 = dma.done.wait [#allocation18], 8192  }
  0x30   :  { %2319 = vsyncadd [#allocation18], 4294959104  ;;  %v271_v0 = vld [vmem:[#allocation5 + $0x78] sm:$0xff]  ;;  %v270_v1 = vld [vmem:[#allocation5 + $0x70] sm:$0xff]  ;;  %vm349_vm0 = vcmask 64512   ;;  %vm619_vm2 = vcmask 1040384  }
  0x31   :  { %v235_v2 = vld [vmem:[#allocation2 + $0x78] sm:$0xff]  ;;  %272 = vmatpush.msra.mxu1 %v271_v0  ;;  %v234_v3 = vld [vmem:[#allocation2 + $0x70] sm:$0xff]  ;;  %v269_v4 = vld [vmem:[#allocation5 + $0x68] sm:$0xff]  ;;  %vm757_vm6 = vcmask 7168   ;;  %s1865_s30 = sshll.u32 %s2770_s13, 4  ;;  %s2344_s2 = smov [#allocation21]   ;;  %s1866_s30 = int_to_ptr.hbm [resolvable:$true] %s1865_s30 }
  0x32   :  { %236 = vmatpush.msra.mxu0 %v235_v2  ;;  %v233_v5 = vld [vmem:[#allocation2 + $0x68] sm:$0xff]  ;;  %v268_v6 = vld [vmem:[#allocation5 + $0x60] sm:$0xff]  ;;  %v267_v8 = vld [vmem:[#allocation5 + $0x58] sm:$0xff]  ;;  %s1874_s15 = sshll.u32 %s2344_s2, 4  ;;  %s1876_s16 = sshll.u32 %s2771_s14, 4  ;;  %s1875_s15 = int_to_ptr.vmem [resolvable:$true] %s1874_s15  ;;  %s1877_s16 = int_to_ptr.hbm [resolvable:$true] %s1876_s16 }
  0x33   :  { %273 = vmatpush.msra.mxu1 %v270_v1  ;;  %v232_v7 = vld [vmem:[#allocation2 + $0x60] sm:$0xff]  ;;  %v231_v9 = vld [vmem:[#allocation2 + $0x58] sm:$0xff]  ;;  %v266_v10 = vld [vmem:[#allocation5 + $0x50] sm:$0xff] }
  0x34   :  { %237 = vmatpush.msra.mxu0 %v234_v3  ;;  %v230_v11 = vld [vmem:[#allocation2 + $0x50] sm:$0xff]  ;;  %v265_v12 = vld [vmem:[#allocation5 + $0x48] sm:$0xff]  ;;  %v264_v14 = vld [vmem:[#allocation5 + $0x40] sm:$0xff] }
  0x35   :  { %274 = vmatpush.msra.mxu1 %v269_v4  ;;  %v229_v13 = vld [vmem:[#allocation2 + $0x48] sm:$0xff]  ;;  %v228_v15 = vld [vmem:[#allocation2 + $0x40] sm:$0xff]  ;;  %v263_v16 = vld [vmem:[#allocation5 + $0x38] sm:$0xff] }
  0x36   :  { %238 = vmatpush.msra.mxu0 %v233_v5  ;;  %v227_v17 = vld [vmem:[#allocation2 + $0x38] sm:$0xff]  ;;  %v262_v18 = vld [vmem:[#allocation5 + $0x30] sm:$0xff]  ;;  %v261_v20 = vld [vmem:[#allocation5 + $0x28] sm:$0xff] }
  0x37   :  { %275 = vmatpush.msra.mxu1 %v268_v6  ;;  %v226_v19 = vld [vmem:[#allocation2 + $0x30] sm:$0xff]  ;;  %v225_v21 = vld [vmem:[#allocation2 + $0x28] sm:$0xff]  ;;  %v260_v22 = vld [vmem:[#allocation5 + $0x20] sm:$0xff] }
  0x38   :  { %239 = vmatpush.msra.mxu0 %v232_v7  ;;  %v224_v23 = vld [vmem:[#allocation2 + $0x20] sm:$0xff]  ;;  %v259_v24 = vld [vmem:[#allocation5 + $0x18] sm:$0xff]  ;;  %v258_v26 = vld [vmem:[#allocation5 + $0x10] sm:$0xff] }
  0x39   :  { %276 = vmatpush.msra.mxu1 %v267_v8  ;;  %v223_v25 = vld [vmem:[#allocation2 + $0x18] sm:$0xff]  ;;  %v222_v27 = vld [vmem:[#allocation2 + $0x10] sm:$0xff]  ;;  %v257_v28 = vld [vmem:[#allocation5 + $0x8] sm:$0xff] }
  0x3a   :  { %240 = vmatpush.msra.mxu0 %v231_v9  ;;  %v221_v29 = vld [vmem:[#allocation2 + $0x8] sm:$0xff]  ;;  %v256_v30 = vld [vmem:[#allocation5] sm:$0xff]  ;;  %v307_v35 = vld [vmem:[#allocation7 + $0x78] sm:$0xff] }
  0x3b   :  { %277 = vmatpush.msra.mxu1 %v266_v10  ;;  %v220_v31 = vld [vmem:[#allocation2] sm:$0xff]  ;;  %v306_v36 = vld [vmem:[#allocation7 + $0x70] sm:$0xff]  ;;  %308 = vmatpush.msra.mxu2 %v307_v35  ;;  %v305_v37 = vld [vmem:[#allocation7 + $0x68] sm:$0xff] }
  0x3c   :  { %241 = vmatpush.msra.mxu0 %v230_v11  ;;  %v2483_v32 = vld [vmem:[%s2757_s0] sm:$0xff]  ;;  %v303_v39 = vld [vmem:[#allocation7 + $0x58] sm:$0xff]  ;;  %v302_v40 = vld [vmem:[#allocation7 + $0x50] sm:$0xff] }
  0x3d   :  { %278 = vmatpush.msra.mxu1 %v265_v12  ;;  %309 = vmatpush.msra.mxu2 %v306_v36  ;;  %v304_v38 = vld [vmem:[#allocation7 + $0x60] sm:$0xff]  ;;  %v301_v41 = vld [vmem:[#allocation7 + $0x48] sm:$0xff]  ;;  %v299_v43 = vld [vmem:[#allocation7 + $0x38] sm:$0xff] }
  0x3e   :  { %242 = vmatpush.msra.mxu0 %v229_v13  ;;  %v300_v42 = vld [vmem:[#allocation7 + $0x40] sm:$0xff]  ;;  %v298_v44 = vld [vmem:[#allocation7 + $0x30] sm:$0xff]  ;;  %v297_v45 = vld [vmem:[#allocation7 + $0x28] sm:$0xff] }
  0x3f   :  { %279 = vmatpush.msra.mxu1 %v264_v14  ;;  %310 = vmatpush.msra.mxu2 %v305_v37  ;;  %v296_v46 = vld [vmem:[#allocation7 + $0x20] sm:$0xff]  ;;  %v295_v47 = vld [vmem:[#allocation7 + $0x18] sm:$0xff]  ;;  %v294_v48 = vld [vmem:[#allocation7 + $0x10] sm:$0xff] }
  0x40   :  { %243 = vmatpush.msra.mxu0 %v228_v15  ;;  %v293_v49 = vld [vmem:[#allocation7 + $0x8] sm:$0xff]  ;;  %v292_v51 = vld [vmem:[#allocation7] sm:$0xff]  ;;  %v399_v60 = vld [vmem:[#allocation8 + $0x78] sm:$0xff] }
  0x41   :  { %280 = vmatpush.msra.mxu1 %v263_v16  ;;  %311 = vmatpush.msra.mxu2 %v304_v38  ;;  %v398_v61 = vld [vmem:[#allocation8 + $0x70] sm:$0xff]  ;;  %v397_v62 = vld [vmem:[#allocation8 + $0x68] sm:$0xff]  ;;  %v396_v63 = vld [vmem:[#allocation8 + $0x60] sm:$0xff] }
  0x42   :  { %244 = vmatpush.msra.mxu0 %v227_v17  ;;  %v395_v0 = vld [vmem:[#allocation8 + $0x58] sm:$0xff]  ;;  %v394_v1 = vld [vmem:[#allocation8 + $0x50] sm:$0xff]  ;;  %v393_v2 = vld [vmem:[#allocation8 + $0x48] sm:$0xff] }
  0x43   :  { %281 = vmatpush.msra.mxu1 %v262_v18  ;;  %312 = vmatpush.msra.mxu2 %v303_v39  ;;  %v392_v3 = vld [vmem:[#allocation8 + $0x40] sm:$0xff]  ;;  %v391_v4 = vld [vmem:[#allocation8 + $0x38] sm:$0xff]  ;;  %v390_v5 = vld [vmem:[#allocation8 + $0x30] sm:$0xff] }
  0x44   :  { %245 = vmatpush.msra.mxu0 %v226_v19  ;;  %v389_v6 = vld [vmem:[#allocation8 + $0x28] sm:$0xff]  ;;  %v388_v7 = vld [vmem:[#allocation8 + $0x20] sm:$0xff]  ;;  %v387_v9 = vld [vmem:[#allocation8 + $0x18] sm:$0xff] }
  0x45   :  { %282 = vmatpush.msra.mxu1 %v261_v20  ;;  %313 = vmatpush.msra.mxu2 %v302_v40  ;;  %v386_v10 = vld [vmem:[#allocation8 + $0x10] sm:$0xff]  ;;  %v385_v11 = vld [vmem:[#allocation8 + $0x8] sm:$0xff]  ;;  %v384_v14 = vld [vmem:[#allocation8] sm:$0xff] }
  0x46   :  { %246 = vmatpush.msra.mxu0 %v225_v21  ;;  %v451_v15 = vld [vmem:[#allocation10 + $0xf0] sm:$0xff]  ;;  %v452_v16 = vld [vmem:[#allocation10 + $0xf8] sm:$0xff]  ;;  %v449_v17 = vld [vmem:[#allocation10 + $0xe0] sm:$0xff] }
  0x47   :  { %283 = vmatpush.msra.mxu1 %v260_v22  ;;  %314 = vmatpush.msra.mxu2 %v301_v41  ;;  %v450_v18 = vld [vmem:[#allocation10 + $0xe8] sm:$0xff]  ;;  %v447_v19 = vld [vmem:[#allocation10 + $0xd0] sm:$0xff]  ;;  %v448_v20 = vld [vmem:[#allocation10 + $0xd8] sm:$0xff] }
  0x48   :  { %247 = vmatpush.msra.mxu0 %v224_v23  ;;  %v445_v21 = vld [vmem:[#allocation10 + $0xc0] sm:$0xff]  ;;  %v446_v22 = vld [vmem:[#allocation10 + $0xc8] sm:$0xff]  ;;  %v443_v23 = vld [vmem:[#allocation10 + $0xb0] sm:$0xff] }
  0x49   :  { %284 = vmatpush.msra.mxu1 %v259_v24  ;;  %315 = vmatpush.msra.mxu2 %v300_v42  ;;  %v444_v24 = vld [vmem:[#allocation10 + $0xb8] sm:$0xff]  ;;  %v434_v35 = vld [vmem:[#allocation10 + $0x68] sm:$0xff]  ;;  %v431_v36 = vld [vmem:[#allocation10 + $0x50] sm:$0xff] }
  0x4a   :  { %248 = vmatpush.msra.mxu0 %v223_v25  ;;  %v441_v25 = vld [vmem:[#allocation10 + $0xa0] sm:$0xff]  ;;  %v432_v37 = vld [vmem:[#allocation10 + $0x58] sm:$0xff]  ;;  %v430_v39 = vld [vmem:[#allocation10 + $0x48] sm:$0xff] }
  0x4b   :  { %285 = vmatpush.msra.mxu1 %v258_v26  ;;  %316 = vmatpush.msra.mxu2 %v299_v43  ;;  %v442_v26 = vld [vmem:[#allocation10 + $0xa8] sm:$0xff]  ;;  %v429_v38 = vld [vmem:[#allocation10 + $0x40] sm:$0xff]  ;;  %v427_v40 = vld [vmem:[#allocation10 + $0x30] sm:$0xff] }
  0x4c   :  { %249 = vmatpush.msra.mxu0 %v222_v27  ;;  %v439_v27 = vld [vmem:[#allocation10 + $0x90] sm:$0xff]  ;;  %v428_v41 = vld [vmem:[#allocation10 + $0x38] sm:$0xff]  ;;  %v425_v42 = vld [vmem:[#allocation10 + $0x20] sm:$0xff] }
  0x4d   :  { %286 = vmatpush.msra.mxu1 %v257_v28  ;;  %317 = vmatpush.msra.mxu2 %v298_v44  ;;  %v440_v28 = vld [vmem:[#allocation10 + $0x98] sm:$0xff]  ;;  %v426_v43 = vld [vmem:[#allocation10 + $0x28] sm:$0xff] }
  0x4e   :  { %250 = vmatpush.msra.mxu0 %v221_v29  ;;  %v437_v29 = vld [vmem:[#allocation10 + $0x80] sm:$0xff] }
  0x4f   :  { %287 = vmatpush.msra.mxu1 %v256_v30  ;;  %318 = vmatpush.msra.mxu2 %v297_v45  ;;  %v438_v30 = vld [vmem:[#allocation10 + $0x88] sm:$0xff]  ;;  %v423_v45 = vld [vmem:[#allocation10 + $0x10] sm:$0xff] }
  0x50   :  { %251 = vmatpush.msra.mxu0 %v220_v31  ;;  %288 = vmatmul.f32.vlgmr.msra.gmra.mxu1 %v2483_v32  ;;  %v435_v31 = vld [vmem:[#allocation10 + $0x70] sm:$0xff] }
  0x51   :  { %252 = vmatmul.f32.vlgmr.msra.gmra.mxu0 %v2483_v32  ;;  %319 = vmatpush.msra.mxu2 %v296_v46  ;;  %v424_v46 = vld [vmem:[#allocation10 + $0x18] sm:$0xff] }
  0x52   :  { %453 = vmatpush.msrb.mxu0 %v451_v15  ;;  %473 = vmatpush.msrb.mxu1 %v452_v16  ;;  %v496_v15 = vld [vmem:[#allocation11 + $0x8] sm:$0xff] }
  0x53   :  { %320 = vmatpush.msra.mxu2 %v295_v47  ;;  %v421_v47 = vld [vmem:[#allocation10] sm:$0xff]  ;;  %v512_v16 = vld [vmem:[#allocation11 + $0x88] sm:$0xff] }
  0x54   :  { %454 = vmatpush.msrb.mxu0 %v449_v17  ;;  %474 = vmatpush.msrb.mxu1 %v450_v18  ;;  %v495_v17 = vld [vmem:[#allocation11] sm:$0xff] }
  0x55   :  { %321 = vmatpush.msra.mxu2 %v294_v48  ;;  %v422_v48 = vld [vmem:[#allocation10 + $0x8] sm:$0xff]  ;;  %v511_v18 = vld [vmem:[#allocation11 + $0x80] sm:$0xff] }
  0x56   :  { %455 = vmatpush.msrb.mxu0 %v447_v19  ;;  %475 = vmatpush.msrb.mxu1 %v448_v20  ;;  %v597_v19 = vld [vmem:[#allocation13 + $0x78] sm:$0xff]  ;;  %v596_v20 = vld [vmem:[#allocation13 + $0x70] sm:$0xff] }
  0x57   :  { %322 = vmatpush.msra.mxu2 %v293_v49  ;;  %v510_v49 = vld [vmem:[#allocation11 + $0x78] sm:$0xff] }
  0x58   :  { %456 = vmatpush.msrb.mxu0 %v445_v21  ;;  %476 = vmatpush.msrb.mxu1 %v446_v22  ;;  %v595_v21 = vld [vmem:[#allocation13 + $0x68] sm:$0xff]  ;;  %v594_v22 = vld [vmem:[#allocation13 + $0x60] sm:$0xff] }
  0x59   :  { %323 = vmatpush.msra.mxu2 %v292_v51  ;;  %v509_v51 = vld [vmem:[#allocation11 + $0x70] sm:$0xff] }
  0x5a   :  { %324 = vmatmul.f32.vlgmr.msra.gmra.mxu2 %v2483_v32  ;;  %457 = vmatpush.msrb.mxu0 %v443_v23  ;;  %v593_v23 = vld [vmem:[#allocation13 + $0x58] sm:$0xff] }
  0x5b   :  { %477 = vmatpush.msrb.mxu1 %v444_v24  ;;  %527 = vmatpush.msrb.mxu2 %v510_v49 }
  0x5c   :  { %458 = vmatpush.msrb.mxu0 %v441_v25 }
  0x5d   :  { %478 = vmatpush.msrb.mxu1 %v442_v26  ;;  %528 = vmatpush.msrb.mxu2 %v509_v51 }
  0x5e   :  { %459 = vmatpush.msrb.mxu0 %v439_v27 }
  0x5f   :  { %479 = vmatpush.msrb.mxu1 %v440_v28  ;;  %v591_v28 = vld [vmem:[#allocation13 + $0x48] sm:$0xff] }
  0x60   :  { %460 = vmatpush.msrb.mxu0 %v437_v29  ;;  %v590_v29 = vld [vmem:[#allocation13 + $0x40] sm:$0xff] }
  0x61   :  { %480 = vmatpush.msrb.mxu1 %v438_v30  ;;  %v589_v30 = vld [vmem:[#allocation13 + $0x38] sm:$0xff] }
  0x62   :  { %461 = vmatpush.msrb.mxu0 %v435_v31  ;;  %v588_v31 = vld [vmem:[#allocation13 + $0x30] sm:$0xff] }
  0xcd   :  { %v289_v33 = vpop.f32.mrf.mxu1 }
  0xce   :  { %343 = vmatpush.xpose.msra.mxu3 %v289_v33  ;;  %v253_v34 = vpop.f32.mrf.mxu0  ;;  %v436_v33 = vld [vmem:[#allocation10 + $0x78] sm:$0xff] }
  0xcf   :  { %481 = vmatpush.msrb.mxu1 %v436_v33  ;;  %v587_v33 = vld [vmem:[#allocation13 + $0x28] sm:$0xff] }
  0xd1   :  { %344 = vmatmul.f32.vlgmr.msra.gmra.mxu3 %v253_v34  ;;  %v433_v34 = vld [vmem:[#allocation10 + $0x60] sm:$0xff]  ;;  %482 = vmatpush.msrb.mxu1 %v434_v35  ;;  %v585_v35 = vld [vmem:[#allocation13 + $0x18] sm:$0xff] }
  0xd2   :  { %462 = vmatpush.msrb.mxu0 %v433_v34  ;;  %v586_v34 = vld [vmem:[#allocation13 + $0x20] sm:$0xff] }
  0xd3   :  { %483 = vmatpush.msrb.mxu1 %v432_v37  ;;  %v583_v37 = vld [vmem:[#allocation13 + $0x8] sm:$0xff] }
  0xd4   :  { %463 = vmatpush.msrb.mxu0 %v431_v36  ;;  %v584_v36 = vld [vmem:[#allocation13 + $0x10] sm:$0xff] }
  0xd5   :  { %484 = vmatpush.msrb.mxu1 %v430_v39  ;;  %v2339_v39 = vmov 8.0  }
  0xd6   :  { %464 = vmatpush.msrb.mxu0 %v429_v38  ;;  %v582_v38 = vld [vmem:[#allocation13] sm:$0xff] }
  0xd7   :  { %485 = vmatpush.msrb.mxu1 %v428_v41 }
  0xd8   :  { %465 = vmatpush.msrb.mxu0 %v427_v40 }
  0xd9   :  { %486 = vmatpush.msrb.mxu1 %v426_v43 }
  0xda   :  { %466 = vmatpush.msrb.mxu0 %v425_v42 }
  0xdb   :  { %487 = vmatpush.msrb.mxu1 %v424_v46 }
  0xdc   :  { %467 = vmatpush.msrb.mxu0 %v423_v45 }
  0xdd   :  { %v325_v59 = vpop.f32.mrf.mxu2  ;;  %488 = vmatpush.msrb.mxu1 %v422_v48 }
  0xde   :  { %379 = vmatpush.msrb.mxu3 %v325_v59  ;;  %468 = vmatpush.msrb.mxu0 %v421_v47  ;;  %v505_v59 = vld [vmem:[#allocation11 + $0x50] sm:$0xff] }
  0xe0   :  { %400 = vmatpush.msra.mxu3 %v399_v60  ;;  %v521_v60 = vld [vmem:[#allocation11 + $0xd0] sm:$0xff]  ;;  %598 = vmatpush.msra.mxu0 %v597_v19 }
  0xe2   :  { %401 = vmatpush.msra.mxu3 %v398_v61  ;;  %v504_v61 = vld [vmem:[#allocation11 + $0x48] sm:$0xff]  ;;  %599 = vmatpush.msra.mxu0 %v596_v20 }
  0xe4   :  { %402 = vmatpush.msra.mxu3 %v397_v62  ;;  %v520_v62 = vld [vmem:[#allocation11 + $0xc8] sm:$0xff]  ;;  %600 = vmatpush.msra.mxu0 %v595_v21 }
  0xe6   :  { %403 = vmatpush.msra.mxu3 %v396_v63  ;;  %v503_v63 = vld [vmem:[#allocation11 + $0x40] sm:$0xff]  ;;  %601 = vmatpush.msra.mxu0 %v594_v22 }
  0xe8   :  { %404 = vmatpush.msra.mxu3 %v395_v0  ;;  %v519_v0 = vld [vmem:[#allocation11 + $0xc0] sm:$0xff]  ;;  %602 = vmatpush.msra.mxu0 %v593_v23 }
  0xea   :  { %405 = vmatpush.msra.mxu3 %v394_v1  ;;  %v502_v1 = vld [vmem:[#allocation11 + $0x38] sm:$0xff] }
  0xec   :  { %406 = vmatpush.msra.mxu3 %v393_v2  ;;  %v518_v2 = vld [vmem:[#allocation11 + $0xb8] sm:$0xff] }
  0xee   :  { %407 = vmatpush.msra.mxu3 %v392_v3  ;;  %v501_v3 = vld [vmem:[#allocation11 + $0x30] sm:$0xff] }
  0xf0   :  { %408 = vmatpush.msra.mxu3 %v391_v4  ;;  %v517_v4 = vld [vmem:[#allocation11 + $0xb0] sm:$0xff] }
  0xf2   :  { %409 = vmatpush.msra.mxu3 %v390_v5  ;;  %v500_v5 = vld [vmem:[#allocation11 + $0x28] sm:$0xff] }
  0xf4   :  { %410 = vmatpush.msra.mxu3 %v389_v6  ;;  %v516_v6 = vld [vmem:[#allocation11 + $0xa8] sm:$0xff] }
  0xf6   :  { %411 = vmatpush.msra.mxu3 %v388_v7  ;;  %v499_v7 = vld [vmem:[#allocation11 + $0x20] sm:$0xff] }
  0xf8   :  { %412 = vmatpush.msra.mxu3 %v387_v9  ;;  %v498_v9 = vld [vmem:[#allocation11 + $0x18] sm:$0xff] }
  0xfa   :  { %413 = vmatpush.msra.mxu3 %v386_v10  ;;  %v514_v10 = vld [vmem:[#allocation11 + $0x98] sm:$0xff] }
  0xfc   :  { %414 = vmatpush.msra.mxu3 %v385_v11  ;;  %v497_v11 = vld [vmem:[#allocation11 + $0x10] sm:$0xff] }
  0xfe   :  { %415 = vmatpush.msra.mxu3 %v384_v14 }
 0x154   :  { %v345_v50 = vpop.f32.mrf.mxu3 }
 0x155   :  { %v348_v52 = vmul.f32 0.088388346, %v345_v50  ;;  %v526_v50 = vld [vmem:[#allocation11 + $0xf8] sm:$0xff] }
 0x157   :  { %v350_v53 = vsel %vm349_vm0, %v348_v52, -inf }
 0x158   :  { %351 = vmax.xlane.f32.xlu0 %v350_v53  ;;  %v508_v53 = vld [vmem:[#allocation11 + $0x68] sm:$0xff] }
 0x159   :  { %529 = vmatpush.msrb.mxu2 %v508_v53 }
 0x1cb   :  { %v352_v54 = vpop.xlane.xlu0 %351 }
 0x1cc   :  { %v353_v55 = vsub.f32 %v348_v52, %v352_v54  ;;  %v525_v52 = vld [vmem:[#allocation11 + $0xf0] sm:$0xff]  ;;  %v524_v54 = vld [vmem:[#allocation11 + $0xe8] sm:$0xff] }
 0x1ce   :  { %v354_v56 = vmul.f32 1.442695, %v353_v55  ;;  %v507_v55 = vld [vmem:[#allocation11 + $0x60] sm:$0xff] }
 0x1cf   :  { %530 = vmatpush.msrb.mxu2 %v507_v55 }
 0x1d0   :  { %1980 = vpow2.f32 %v354_v56  ;;  %v523_v56 = vld [vmem:[#allocation11 + $0xe0] sm:$0xff] }
 0x1d6   :  { %v1981_v57 = vpop.eup %1980 }
 0x1d7   :  { %v356_v58 = vsel %vm349_vm0, %v1981_v57, 0.0 }
 0x1d8   :  { %357 = vadd.xlane.f32.xlu0 %v356_v58  ;;  %v522_v58 = vld [vmem:[#allocation11 + $0xd8] sm:$0xff] }
 0x24b   :  { %v358_v8 = vpop.xlane.xlu0 %357 }
 0x24c   :  { %1982 = vrcp.f32 %v358_v8  ;;  %v515_v8 = vld [vmem:[#allocation11 + $0xa0] sm:$0xff] }
 0x24d   :  { %1984 = vrcp.f32 %v2339_v39 }
 0x252   :  { %v1983_v12 = vpop.eup %1982 }
 0x253   :  { %v360_v13 = vmul.f32 %v1983_v12, %v1981_v57  ;;  %v506_v57 = vld [vmem:[#allocation11 + $0x58] sm:$0xff]  ;;  %v513_v12 = vld [vmem:[#allocation11 + $0x90] sm:$0xff]  ;;  %v1985_v40 = vpop.eup %1984 }
 0x254   :  { %531 = vmatpush.msrb.mxu2 %v506_v57  ;;  %v575_v41 = vmul.f32 8.0, %v1985_v40  ;;  %vm579_vm1 = vweird.f32 %v1985_v40  ;;  %v645_v57 = vld [vmem:[#allocation14 + $0x38] sm:$0xff] }
 0x255   :  { %1896 = vmatmul.msk.f32.vlgmr.msrb.gmra.mxu3 %vm349_vm0, %v360_v13  ;;  %678 = vmatpush.xpose.msra.mxu1 %v645_v57 }
 0x256   :  { %547 = vmatpush.msrb.mxu3 %v526_v50  ;;  %532 = vmatpush.msrb.mxu2 %v505_v59  ;;  %v576_v45 = vsub.f32 1.0, %v575_v41  ;;  %v643_v59 = vld [vmem:[#allocation14 + $0x28] sm:$0xff] }
 0x258   :  { %548 = vmatpush.msrb.mxu3 %v525_v52  ;;  %533 = vmatpush.msrb.mxu2 %v504_v61  ;;  %v577_v48 = vmul.f32 %v1985_v40, %v576_v45 }
 0x25a   :  { %549 = vmatpush.msrb.mxu3 %v524_v54  ;;  %534 = vmatpush.msrb.mxu2 %v503_v63  ;;  %v578_v51 = vadd.f32 %v1985_v40, %v577_v48  ;;  %v642_v63 = vld [vmem:[#allocation14 + $0x20] sm:$0xff] }
 0x25c   :  { %550 = vmatpush.msrb.mxu3 %v523_v56  ;;  %535 = vmatpush.msrb.mxu2 %v502_v1  ;;  %v580_v54 = vsel %vm579_vm1, %v1985_v40, %v578_v51  ;;  %v640_v1 = vld [vmem:[#allocation14 + $0x10] sm:$0xff] }
 0x25e   :  { %551 = vmatpush.msrb.mxu3 %v522_v58  ;;  %536 = vmatpush.msrb.mxu2 %v501_v3  ;;  %v644_v58 = vld [vmem:[#allocation14 + $0x30] sm:$0xff]  ;;  %v638_v3 = vld [vmem:[#allocation14] sm:$0xff] }
 0x25f   :  { %679 = vmatpush.xpose.msra.mxu1 %v644_v58 }
 0x260   :  { %552 = vmatpush.msrb.mxu3 %v521_v60  ;;  %537 = vmatpush.msrb.mxu2 %v500_v5  ;;  %v646_v5 = vmul.f32 %v638_v3, %v638_v3 }
 0x262   :  { %553 = vmatpush.msrb.mxu3 %v520_v62  ;;  %538 = vmatpush.msrb.mxu2 %v499_v7  ;;  %v635_v7 = vlaneseq }
 0x263   :  { %680 = vmatpush.xpose.msra.mxu1 %v643_v59 }
 0x264   :  { %554 = vmatpush.msrb.mxu3 %v519_v0  ;;  %539 = vmatpush.msrb.mxu2 %v498_v9  ;;  %v641_v0 = vld [vmem:[#allocation14 + $0x18] sm:$0xff]  ;;  %v648_v9 = vmul.f32 %v640_v1, %v640_v1 }
 0x266   :  { %555 = vmatpush.msrb.mxu3 %v518_v2  ;;  %540 = vmatpush.msrb.mxu2 %v497_v11  ;;  %v639_v2 = vld [vmem:[#allocation14 + $0x8] sm:$0xff] }
 0x267   :  { %681 = vmatpush.xpose.msra.mxu1 %v642_v63 }
 0x268   :  { %556 = vmatpush.msrb.mxu3 %v517_v4  ;;  %541 = vmatpush.msrb.mxu2 %v496_v15  ;;  %v647_v4 = vmul.f32 %v639_v2, %v639_v2 }
 0x26a   :  { %557 = vmatpush.msrb.mxu3 %v516_v6  ;;  %542 = vmatpush.msrb.mxu2 %v495_v17  ;;  %v649_v6 = vmul.f32 %v641_v0, %v641_v0  ;;  %v653_v17 = vmul.f32 %v645_v57, %v645_v57 }
 0x26b   :  { %682 = vmatpush.xpose.msra.mxu1 %v641_v0  ;;  %656 = vadd.xlane.f32.xlu2 %v647_v4 }
 0x26c   :  { %558 = vmatpush.msrb.mxu3 %v515_v8  ;;  %897 = vmatpush.msra.mxu2 %v645_v57  ;;  %v2494_v8 = vshrl.u32 %v635_v7, 7 }
 0x26d   :  { %660 = vadd.xlane.f32.xlu0 %v649_v6 }
 0x26e   :  { %559 = vmatpush.msrb.mxu3 %v514_v10  ;;  %898 = vmatpush.msra.mxu2 %v644_v58  ;;  %v650_v10 = vmul.f32 %v642_v63, %v642_v63  ;;  %v2498_v11 = vadd.s32 16, %v2494_v8 }
 0x26f   :  { %683 = vmatpush.xpose.msra.mxu1 %v640_v1  ;;  %1931 = vset.pattern.permute.xlu2 %v2494_v8 }
 0x270   :  { %560 = vmatpush.msrb.mxu3 %v513_v12  ;;  %899 = vmatpush.msra.mxu2 %v643_v59  ;;  %v2501_v12 = vadd.s32 8, %v2494_v8 }
 0x271   :  { %1933 = vset.pattern.permute.xlu1 %v2498_v11 }
 0x272   :  { %561 = vmatpush.msrb.mxu3 %v512_v16  ;;  %900 = vmatpush.msra.mxu2 %v642_v63  ;;  %v651_v16 = vmul.f32 %v643_v59, %v643_v59 }
 0x273   :  { %684 = vmatpush.xpose.msra.mxu1 %v639_v2  ;;  %1932 = vset.pattern.permute.xlu0 %v2501_v12 }
 0x274   :  { %562 = vmatpush.msrb.mxu3 %v511_v18  ;;  %901 = vmatpush.msra.mxu2 %v641_v0 }
 0x275   :  { %658 = vadd.xlane.f32.xlu2 %v648_v9 }
 0x276   :  { %902 = vmatpush.msra.mxu2 %v640_v1 }
 0x277   :  { %685 = vmatpush.xpose.msra.mxu1 %v638_v3 }
 0x278   :  { %903 = vmatpush.msra.mxu2 %v639_v2 }
 0x27a   :  { %904 = vmatpush.msra.mxu2 %v638_v3 }
 0x27d   :  { %664 = vadd.xlane.f32.xlu2 %v651_v16 }
 0x2d8   :  { %v381_v44 = vpop.f32.mrf.mxu3 }
 0x2d9   :  { %416 = vmatmul.f32.vlgmr.msra.gmra.mxu3 %v381_v44 }
 0x2e0   :  { %v661_v41 = vpop.xlane.xlu0 %660 }
 0x35c   :  { %v417_v13 = vpop.f32.mrf.mxu3 }
 0x35d   :  { %v420_v14 = vadd.f32 %v417_v13, %v2483_v32  ;;  %v592_v32 = vld [vmem:[#allocation13 + $0x50] sm:$0xff]  ;;  %v652_v13 = vmul.f32 %v644_v58, %v644_v58 }
 0x35e   :  { %603 = vmatpush.msra.mxu0 %v592_v32 }
 0x35f   :  { %469 = vmatmul.f32.vlgmr.msrb.gmra.mxu0 %v420_v14  ;;  %489 = vmatmul.f32.vlgmr.msrb.gmra.mxu1 %v420_v14 }
 0x360   :  { %604 = vmatpush.msra.mxu0 %v591_v28  ;;  %666 = vadd.xlane.f32.xlu0 %v652_v13  ;;  %v2509_v28 = vadd.s32 40, %v2494_v8 }
 0x362   :  { %605 = vmatpush.msra.mxu0 %v590_v29  ;;  %v2512_v29 = vadd.s32 24, %v2494_v8 }
 0x364   :  { %606 = vmatpush.msra.mxu0 %v589_v30  ;;  %v2517_v30 = vadd.s32 56, %v2494_v8 }
 0x366   :  { %607 = vmatpush.msra.mxu0 %v588_v31  ;;  %v2520_v31 = vadd.s32 32, %v2494_v8 }
 0x368   :  { %608 = vmatpush.msra.mxu0 %v587_v33  ;;  %v2525_v33 = vadd.s32 48, %v2494_v8 }
 0x36a   :  { %609 = vmatpush.msra.mxu0 %v586_v34  ;;  %v2530_v34 = vand.u32 127, %v635_v7 }
 0x36c   :  { %610 = vmatpush.msra.mxu0 %v585_v35  ;;  %v657_v35 = vpop.xlane.xlu2 %656 }
 0x36e   :  { %611 = vmatpush.msra.mxu0 %v584_v36 }
 0x370   :  { %612 = vmatpush.msra.mxu0 %v583_v37 }
 0x372   :  { %613 = vmatpush.msra.mxu0 %v582_v38 }
 0x374   :  { %v659_v36 = vpop.xlane.xlu2 %658 }
 0x37c   :  { %v665_v38 = vpop.xlane.xlu2 %664 }
 0x3d3   :  { %v667_v45 = vpop.xlane.xlu0 %666 }
 0x3dc   :  { %v470_v24 = vpop.f32.mrf.mxu0  ;;  %v490_v25 = vpop.f32.mrf.mxu1 }
 0x3dd   :  { %v493_v26 = vmax.f32 %v470_v24, 0.0  ;;  %v494_v27 = vmax.f32 %v490_v25, 0.0 }
 0x3df   :  { %543 = vmatmul.f32.vlgmr.msrb.gmra.mxu2 %v493_v26  ;;  %563 = vmatmul.f32.vlgmr.msrb.gmra.mxu3 %v494_v27 }
 0x462   :  { %v544_v42 = vpop.f32.mrf.mxu2  ;;  %v564_v43 = vpop.f32.mrf.mxu3 }
 0x463   :  { %v565_v44 = vadd.f32 %v564_v43, %v544_v42 }
 0x465   :  { %v567_v46 = vadd.f32 %v565_v44, %v420_v14  ;;  %v2340_v44 = vmov 0  }
 0x467   :  { %v568_v47 = vrot.slane %v567_v46, 4 }
 0x469   :  { %v569_v49 = vadd.f32 %v568_v47, %v567_v46 }
 0x46b   :  { %v570_v50 = vrot.slane %v569_v49, 2 }
 0x46d   :  { %v571_v52 = vadd.f32 %v570_v50, %v569_v49 }
 0x46f   :  { %v572_v53 = vrot.slane %v571_v52, 1 }
 0x471   :  { %v573_v55 = vadd.f32 %v572_v53, %v571_v52 }
 0x473   :  { %v581_v56 = vmul.f32 %v580_v54, %v573_v55 }
 0x475   :  { %614 = vmatmul.f32.vlgmr.msra.gmra.mxu0 %v581_v56 }
 0x4f2   :  { %v615_v60 = vpop.f32.mrf.mxu0 }
 0x4f3   :  { %v618_v61 = vmul.f32 %v615_v60, %v615_v60 }
 0x4f5   :  { %v620_v62 = vsel %vm619_vm2, %v618_v61, 0.0 }
 0x4f6   :  { %621 = vadd.xlane.f32.xlu1 %v620_v62 }
 0x4fe   :  { %654 = vadd.xlane.f32.xlu1 %v646_v5 }
 0x506   :  { %662 = vadd.xlane.f32.xlu1 %v650_v10 }
 0x50e   :  { %668 = vadd.xlane.f32.xlu1 %v653_v17 }
 0x569   :  { %v622_v14 = vpop.xlane.xlu1 %621 }
 0x56a   :  { %v623_v15 = vadd.f32 1e-12, %v622_v14 }
 0x56c   :  { %1986 = vrsqrt.f32 %v623_v15  ;;  %vm630_vm4 = vweird.f32 %v623_v15 }
 0x571   :  { %v655_v37 = vpop.xlane.xlu1 %654 }
 0x572   :  { %v1987_v18 = vpop.eup %1986 }
 0x573   :  { %v625_v19 = vmul.f32 %v1987_v18, %v623_v15  ;;  %vm631_vm3 = vweird.f32 %v1987_v18 }
 0x574   :  { %vm632_vm5 = vmor %vm630_vm4, %vm631_vm3 }
 0x575   :  { %v626_v20 = vmul.f32 %v1987_v18, %v625_v19 }
 0x577   :  { %v627_v21 = vmul.f32 0.5, %v626_v20 }
 0x579   :  { %v628_v22 = vsub.f32 1.5, %v627_v21  ;;  %v663_v39 = vpop.xlane.xlu1 %662 }
 0x57b   :  { %v629_v23 = vmul.f32 %v1987_v18, %v628_v22 }
 0x57d   :  { %v633_v32 = vsel %vm632_vm5, %v1987_v18, %v629_v23 }
 0x57e   :  { %v2505_v24 = vmul.f32 %v633_v32, %v615_v60 }
 0x580   :  { %686 = vmatmul.f32.vlgmr.msra.gmra.mxu1 %v2505_v24 }
 0x581   :  { %v669_v42 = vpop.xlane.xlu1 %668 }
 0x5fd   :  { %v687_v25 = vpop.f32.mrf.mxu1 }
 0x5fe   :  { %v690_v26 = vmul.f32 2.0, %v687_v25 }
 0x600   :  { %v692_v27 = vperm.slane %v690_v26, 0 }
 0x602   :  { %709 = vperm.xlu1 %1933, %v692_v27   ;;  %703 = vperm.xlu0 %1932, %v692_v27  }
 0x603   :  { %697 = vperm.xlu2 %1931, %v692_v27  }
 0x60a   :  { %1936 = vset.pattern.permute.xlu1 %v2509_v28  ;;  %1943 = vset.pattern.permute.xlu0 %v2340_v44 }
 0x60b   :  { %1934 = vset.pattern.permute.xlu2 %v2512_v29 }
 0x612   :  { %727 = vperm.xlu1 %1936, %v692_v27  }
 0x613   :  { %715 = vperm.xlu2 %1934, %v692_v27  }
 0x61a   :  { %1938 = vset.pattern.permute.xlu1 %v2517_v30 }
 0x61b   :  { %1935 = vset.pattern.permute.xlu2 %v2520_v31 }
 0x622   :  { %739 = vperm.xlu1 %1938, %v692_v27  }
 0x623   :  { %721 = vperm.xlu2 %1935, %v692_v27  }
 0x62a   :  { %1940 = vset.pattern.permute.xlu1 %v2501_v12 }
 0x62b   :  { %1937 = vset.pattern.permute.xlu2 %v2525_v33 }
 0x632   :  { %802 = vperm.xlu1 %1940, %v2530_v34  }
 0x633   :  { %733 = vperm.xlu2 %1937, %v692_v27  }
 0x63a   :  { %1942 = vset.pattern.permute.xlu1 %v2512_v29 }
 0x63b   :  { %1939 = vset.pattern.permute.xlu2 %v2494_v8 }
 0x642   :  { %814 = vperm.xlu1 %1942, %v2530_v34  }
 0x643   :  { %796 = vperm.xlu2 %1939, %v2530_v34  }
 0x64a   :  { %1946 = vset.pattern.permute.xlu1 %v2525_v33 }
 0x64b   :  { %1941 = vset.pattern.permute.xlu2 %v2498_v11 }
 0x652   :  { %832 = vperm.xlu1 %1946, %v2530_v34  }
 0x653   :  { %808 = vperm.xlu2 %1941, %v2530_v34  }
 0x65a   :  { %1948 = vset.pattern.permute.xlu1 %v2340_v44 }
 0x65b   :  { %1945 = vset.pattern.permute.xlu2 %v2509_v28 }
 0x65d   :  { %v698_v40 = vpop.permute.xlu2 %697 }
 0x65e   :  { %v749_v55 = vsub.f32 %v655_v37, %v698_v40 }
 0x660   :  { %v758_v1 = vsel %vm757_vm6, %v749_v55, inf }
 0x663   :  { %826 = vperm.xlu2 %1945, %v2530_v34  }
 0x66b   :  { %1947 = vset.pattern.permute.xlu2 %v2517_v30 }
 0x66d   :  { %v716_v43 = vpop.permute.xlu2 %715 }
 0x66e   :  { %v752_v56 = vsub.f32 %v661_v41, %v716_v43 }
 0x670   :  { %v761_v2 = vsel %vm757_vm6, %v752_v56, inf }
 0x673   :  { %838 = vperm.xlu2 %1947, %v2530_v34  }
 0x674   :  { %v710_v46 = vpop.permute.xlu1 %709  ;;  %v704_v49 = vpop.permute.xlu0 %703 }
 0x675   :  { %v750_v52 = vsub.f32 %v657_v35, %v704_v49  ;;  %v751_v57 = vsub.f32 %v659_v36, %v710_v46 }
 0x677   :  { %v759_v60 = vsel %vm757_vm6, %v750_v52, inf  ;;  %v760_v3 = vsel %vm757_vm6, %v751_v57, inf }
 0x67b   :  { %1950 = vset.pattern.permute.xlu2 %v2501_v12 }
 0x67d   :  { %v722_v47 = vpop.permute.xlu2 %721 }
 0x67e   :  { %v2548_v53 = vsub.f32 %v663_v39, %v722_v47 }
 0x680   :  { %v762_v61 = vsel %vm757_vm6, %v2548_v53, inf }
 0x681   :  { %v763_v5 = vmin.f32 %v758_v1, %v762_v61 }
 0x684   :  { %v728_v48 = vpop.permute.xlu1 %727 }
 0x685   :  { %v754_v51 = vsub.f32 %v665_v38, %v728_v48 }
 0x687   :  { %v764_v58 = vsel %vm757_vm6, %v754_v51, inf }
 0x688   :  { %v765_v0 = vmin.f32 %v759_v60, %v764_v58 }
 0x68a   :  { %v770_v10 = vmin.f32 %v763_v5, %v765_v0  ;;  %v919_v5 = vld [vmem:[#allocation14 + $0x68] sm:$0xff] }
 0x68d   :  { %v734_v50 = vpop.permute.xlu2 %733 }
 0x68e   :  { %v755_v54 = vsub.f32 %v667_v45, %v734_v50 }
 0x690   :  { %v766_v62 = vsel %vm757_vm6, %v755_v54, inf }
 0x691   :  { %v767_v6 = vmin.f32 %v760_v3, %v766_v62  ;;  %v921_v3 = vld [vmem:[#allocation14 + $0x78] sm:$0xff] }
 0x692   :  { %954 = vmatpush.xpose.msra.mxu3 %v921_v3  ;;  %1123 = vmatpush.msrb.mxu2 %v921_v3 }
 0x694   :  { %v740_v59 = vpop.permute.xlu1 %739 }
 0x695   :  { %v756_v63 = vsub.f32 %v669_v42, %v740_v59 }
 0x697   :  { %v768_v4 = vsel %vm757_vm6, %v756_v63, inf }
 0x698   :  { %v769_v9 = vmin.f32 %v761_v2, %v768_v4  ;;  %v920_v4 = vld [vmem:[#allocation14 + $0x70] sm:$0xff] }
 0x699   :  { %1124 = vmatpush.msrb.mxu2 %v920_v4  ;;  %955 = vmatpush.xpose.msra.mxu3 %v920_v4 }
 0x69a   :  { %v771_v13 = vmin.f32 %v767_v6, %v769_v9  ;;  %v918_v6 = vld [vmem:[#allocation14 + $0x60] sm:$0xff]  ;;  %v917_v9 = vld [vmem:[#allocation14 + $0x58] sm:$0xff] }
 0x69b   :  { %1125 = vmatpush.msrb.mxu2 %v919_v5 }
 0x69c   :  { %v772_v14 = vmin.f32 %v770_v10, %v771_v13  ;;  %v916_v10 = vld [vmem:[#allocation14 + $0x50] sm:$0xff]  ;;  %v915_v13 = vld [vmem:[#allocation14 + $0x48] sm:$0xff] }
 0x69d   :  { %v2562_v21 = vpop.permute.xlu2 %796  ;;  %1126 = vmatpush.msrb.mxu2 %v918_v6  ;;  %956 = vmatpush.xpose.msra.mxu3 %v919_v5 }
 0x69e   :  { %v773_v15 = vrot.slane %v772_v14, 4 }
 0x69f   :  { %1127 = vmatpush.msrb.mxu2 %v917_v9 }
 0x6a0   :  { %v774_v16 = vmin.f32 %v772_v14, %v773_v15  ;;  %v2341_v15 = vmov 0.0  }
 0x6a1   :  { %1128 = vmatpush.msrb.mxu2 %v916_v10  ;;  %957 = vmatpush.xpose.msra.mxu3 %v918_v6 }
 0x6a2   :  { %v775_v17 = vrot.slane %v774_v16, 2 }
 0x6a3   :  { %1129 = vmatpush.msrb.mxu2 %v915_v13 }
 0x6a4   :  { %v776_v18 = vmin.f32 %v774_v16, %v775_v17  ;;  %v2566_v23 = vpop.permute.xlu1 %802  ;;  %v914_v17 = vld [vmem:[#allocation14 + $0x40] sm:$0xff] }
 0x6a5   :  { %958 = vmatpush.xpose.msra.mxu3 %v917_v9  ;;  %1130 = vmatpush.msrb.mxu2 %v914_v17 }
 0x6a6   :  { %v777_v19 = vrot.slane %v776_v18, 1 }
 0x6a8   :  { %v778_v20 = vmin.f32 %v776_v18, %v777_v19  ;;  %v923_v18 = vmul.f32 %v915_v13, %v915_v13  ;;  %v922_v19 = vmul.f32 %v914_v17, %v914_v17 }
 0x6a9   :  { %959 = vmatpush.xpose.msra.mxu3 %v916_v10 }
 0x6aa   :  { %781 = vperm.xlu0 %1943, %v778_v20   ;;  %v924_v20 = vmul.f32 %v916_v10, %v916_v10  ;;  %932 = vadd.xlane.f32.xlu2 %v923_v18 }
 0x6ad   :  { %v2564_v22 = vpop.permute.xlu2 %808  ;;  %960 = vmatpush.xpose.msra.mxu3 %v915_v13 }
 0x6b1   :  { %961 = vmatpush.xpose.msra.mxu3 %v914_v17 }
 0x6b2   :  { %1944 = vset.pattern.permute.xlu0 %v2520_v31 }
 0x6b4   :  { %v2570_v25 = vpop.permute.xlu1 %814 }
 0x6ba   :  { %820 = vperm.xlu0 %1944, %v2530_v34  }
 0x6bd   :  { %v2568_v32 = vpop.permute.xlu2 %826 }
 0x6c2   :  { %1951 = vset.pattern.permute.xlu0 %v2498_v11 }
 0x6c4   :  { %v2574_v35 = vpop.permute.xlu1 %832 }
 0x6cd   :  { %v2572_v27 = vpop.permute.xlu2 %838 }
 0x6e4   :  { %930 = vadd.xlane.f32.xlu0 %v922_v19 }
 0x71c   :  { %v782_v26 = vpop.permute.xlu0 %781 }
 0x71d   :  { %vm787_vm7 = vcmp.le.f32.partialorder %v752_v56, %v782_v26  ;;  %vm791_vm8 = vcmp.le.f32.partialorder %v756_v63, %v782_v26  ;;  %vm786_vm9 = vcmp.le.f32.partialorder %v751_v57, %v782_v26  ;;  %vm790_vm10 = vcmp.le.f32.partialorder %v755_v54, %v782_v26 }
 0x71e   :  { %v843_v36 = vsel %vm787_vm7, %v2570_v25, 64  ;;  %v847_v37 = vsel %vm791_vm8, %v2572_v27, 64  ;;  %v842_v38 = vsel %vm786_vm9, %v2564_v22, 64  ;;  %v846_v39 = vsel %vm790_vm10, %v2574_v35, 64 }
 0x71f   :  { %vm785_vm11 = vcmp.le.f32.partialorder %v750_v52, %v782_v26  ;;  %vm789_vm12 = vcmp.le.f32.partialorder %v754_v51, %v782_v26  ;;  %v851_v40 = vsel %vm757_vm6, %v843_v36, 2147483647  ;;  %v861_v41 = vsel %vm757_vm6, %v847_v37, 2147483647 }
 0x720   :  { %v850_v42 = vsel %vm757_vm6, %v842_v38, 2147483647  ;;  %v858_v43 = vsel %vm757_vm6, %v846_v39, 2147483647  ;;  %v841_v45 = vsel %vm785_vm11, %v2566_v23, 64  ;;  %v845_v46 = vsel %vm789_vm12, %v2568_v32, 64 }
 0x721   :  { %vm784_vm13 = vcmp.le.f32.partialorder %v749_v55, %v782_v26  ;;  %vm862_vm14 = vcmp.lt.s32.totalorder %v851_v40, %v861_v41  ;;  %vm859_vm15 = vcmp.lt.s32.totalorder %v850_v42, %v858_v43  ;;  %v849_v47 = vsel %vm757_vm6, %v841_v45, 2147483647 }
 0x722   :  { %v855_v48 = vsel %vm757_vm6, %v845_v46, 2147483647  ;;  %v840_v49 = vsel %vm784_vm13, %v2562_v21, 64  ;;  %v863_v50 = vsel %vm862_vm14, %v851_v40, %v861_v41  ;;  %v860_v51 = vsel %vm859_vm15, %v850_v42, %v858_v43  ;;  %v933_v46 = vpop.xlane.xlu2 %932 }
 0x723   :  { %vm788_vm0 = vcmp.le.f32.partialorder %v2548_v53, %v782_v26  ;;  %vm856_vm1 = vcmp.lt.s32.totalorder %v849_v47, %v855_v48  ;;  %v848_v56 = vsel %vm757_vm6, %v840_v49, 2147483647  ;;  %vm866_vm3 = vcmp.lt.s32.totalorder %v860_v51, %v863_v50 }
 0x724   :  { %v857_v57 = vsel %vm856_vm1, %v849_v47, %v855_v48  ;;  %v867_v60 = vsel %vm866_vm3, %v860_v51, %v863_v50  ;;  %vm885_vm11 = vcmask 523264   ;;  %v925_v26 = vmul.f32 %v917_v9, %v917_v9 }
 0x725   :  { %v926_v36 = vmul.f32 %v918_v6, %v918_v6  ;;  %v927_v37 = vmul.f32 %v919_v5, %v919_v5  ;;  %v928_v38 = vmul.f32 %v920_v4, %v920_v4  ;;  %v929_v39 = vmul.f32 %v921_v3, %v921_v3 }
 0x726   :  { %936 = vadd.xlane.f32.xlu2 %v925_v26 }
 0x727   :  { %938 = vadd.xlane.f32.xlu0 %v926_v36 }
 0x72c   :  { %v2590_v52 = vpop.permute.xlu0 %820 }
 0x72d   :  { %v844_v54 = vsel %vm788_vm0, %v2590_v52, 64 }
 0x72e   :  { %v852_v55 = vsel %vm757_vm6, %v844_v54, 2147483647  ;;  %942 = vadd.xlane.f32.xlu2 %v928_v38 }
 0x72f   :  { %vm853_vm4 = vcmp.lt.s32.totalorder %v848_v56, %v852_v55  ;;  %944 = vadd.xlane.f32.xlu0 %v929_v39 }
 0x730   :  { %v854_v58 = vsel %vm853_vm4, %v848_v56, %v852_v55 }
 0x731   :  { %vm864_vm5 = vcmp.lt.s32.totalorder %v854_v58, %v857_v57 }
 0x732   :  { %v865_v59 = vsel %vm864_vm5, %v854_v58, %v857_v57 }
 0x733   :  { %vm868_vm7 = vcmp.lt.s32.totalorder %v865_v59, %v867_v60 }
 0x734   :  { %v869_v61 = vsel %vm868_vm7, %v865_v59, %v867_v60 }
 0x735   :  { %v870_v62 = vrot.slane %v869_v61, 4 }
 0x737   :  { %vm871_vm8 = vcmp.lt.s32.totalorder %v869_v61, %v870_v62 }
 0x738   :  { %v872_v53 = vsel %vm871_vm8, %v869_v61, %v870_v62 }
 0x739   :  { %v873_v63 = vrot.slane %v872_v53, 2 }
 0x73b   :  { %vm874_vm9 = vcmp.lt.s32.totalorder %v872_v53, %v873_v63 }
 0x73c   :  { %v875_v0 = vsel %vm874_vm9, %v872_v53, %v873_v63 }
 0x73d   :  { %v876_v1 = vrot.slane %v875_v0, 1 }
 0x73f   :  { %vm877_vm10 = vcmp.lt.s32.totalorder %v875_v0, %v876_v1 }
 0x740   :  { %v878_v2 = vsel %vm877_vm10, %v875_v0, %v876_v1 }
 0x741   :  { %880 = vperm.xlu1 %1948, %v878_v2  }
 0x749   :  { %1949 = vset.pattern.permute.xlu1 %v2494_v8 }
 0x757   :  { %v931_v49 = vpop.xlane.xlu0 %930 }
 0x76b   :  { %934 = vadd.xlane.f32.xlu1 %v924_v20 }
 0x773   :  { %940 = vadd.xlane.f32.xlu1 %v927_v37 }
 0x799   :  { %v937_v47 = vpop.xlane.xlu2 %936 }
 0x79a   :  { %v939_v54 = vpop.xlane.xlu0 %938 }
 0x7a1   :  { %v943_v50 = vpop.xlane.xlu2 %942 }
 0x7a2   :  { %v945_v59 = vpop.xlane.xlu0 %944 }
 0x7b3   :  { %v2596_v14 = vpop.permute.xlu1 %880 }
 0x7b4   :  { %vm882_vm12 = vcmp.eq.s32.totalorder %v2530_v34, %v2596_v14 }
 0x7b5   :  { %v2601_v16 = vsel %vm882_vm12, 1.0, %v2341_v15 }
 0x7b6   :  { %1898 = vmatmul.msk.f32.vlgmr.msra.gmra.mxu2 %vm885_vm11, %v2601_v16 }
 0x7de   :  { %v935_v48 = vpop.xlane.xlu1 %934 }
 0x7e6   :  { %v941_v51 = vpop.xlane.xlu1 %940 }
 0x839   :  { %v906_v40 = vpop.f32.mrf.mxu2 }
 0x83a   :  { %v2606_v41 = vsub.f32 %v2505_v24, %v906_v40 }
 0x83c   :  { %962 = vmatmul.f32.vlgmr.msra.gmra.mxu3 %v2606_v41 }
 0x8bf   :  { %v963_v42 = vpop.f32.mrf.mxu3 }
 0x8c0   :  { %v966_v43 = vmul.f32 2.0, %v963_v42 }
 0x8c2   :  { %v968_v45 = vperm.slane %v966_v43, 0 }
 0x8c4   :  { %985 = vperm.xlu0 %1951, %v968_v45   ;;  %979 = vperm.xlu2 %1950, %v968_v45  }
 0x8c5   :  { %973 = vperm.xlu1 %1949, %v968_v45  }
 0x8cc   :  { %1953 = vset.pattern.permute.xlu2 %v2520_v31  ;;  %1958 = vset.pattern.permute.xlu0 %v2340_v44 }
 0x8cd   :  { %1952 = vset.pattern.permute.xlu1 %v2512_v29 }
 0x8d4   :  { %997 = vperm.xlu2 %1953, %v968_v45  }
 0x8d5   :  { %991 = vperm.xlu1 %1952, %v968_v45  }
 0x8dc   :  { %1955 = vset.pattern.permute.xlu2 %v2525_v33 }
 0x8dd   :  { %1954 = vset.pattern.permute.xlu1 %v2509_v28 }
 0x8e4   :  { %1009 = vperm.xlu2 %1955, %v968_v45  }
 0x8e5   :  { %1003 = vperm.xlu1 %1954, %v968_v45  }
 0x8ec   :  { %1957 = vset.pattern.permute.xlu2 %v2340_v44 }
 0x8ed   :  { %1956 = vset.pattern.permute.xlu1 %v2517_v30 }
 0x8f5   :  { %1015 = vperm.xlu1 %1956, %v968_v45  }
 0x8fd   :  { %1959 = vset.pattern.permute.xlu1 %v2494_v8 }
 0x91e   :  { %v980_v55 = vpop.permute.xlu2 %979 }
 0x91f   :  { %v1026_v63 = vsub.f32 %v933_v46, %v980_v55 }
 0x921   :  { %v1034_v9 = vsel %vm757_vm6, %v1026_v63, inf }
 0x92e   :  { %v998_v58 = vpop.permute.xlu2 %997 }
 0x92f   :  { %v1029_v2 = vsub.f32 %v939_v54, %v998_v58 }
 0x931   :  { %v1037_v19 = vsel %vm757_vm6, %v1029_v2, inf }
 0x936   :  { %v986_v53 = vpop.permute.xlu0 %985 }
 0x937   :  { %v974_v56 = vpop.permute.xlu1 %973  ;;  %v1027_v3 = vsub.f32 %v935_v48, %v986_v53 }
 0x938   :  { %v1025_v0 = vsub.f32 %v931_v49, %v974_v56 }
 0x939   :  { %v1035_v20 = vsel %vm757_vm6, %v1027_v3, inf }
 0x93a   :  { %v1033_v10 = vsel %vm757_vm6, %v1025_v0, inf }
 0x93b   :  { %v1038_v37 = vmin.f32 %v1033_v10, %v1037_v19 }
 0x93e   :  { %v1010_v61 = vpop.permute.xlu2 %1009 }
 0x93f   :  { %v1031_v1 = vsub.f32 %v943_v50, %v1010_v61 }
 0x941   :  { %v1041_v13 = vsel %vm757_vm6, %v1031_v1, inf }
 0x942   :  { %v1042_v38 = vmin.f32 %v1035_v20, %v1041_v13 }
 0x947   :  { %v992_v57 = vpop.permute.xlu1 %991 }
 0x948   :  { %v1028_v4 = vsub.f32 %v937_v47, %v992_v57 }
 0x94a   :  { %v1036_v26 = vsel %vm757_vm6, %v1028_v4, inf }
 0x957   :  { %v1004_v60 = vpop.permute.xlu1 %1003 }
 0x958   :  { %v1030_v62 = vsub.f32 %v941_v51, %v1004_v60 }
 0x95a   :  { %v1039_v5 = vsel %vm757_vm6, %v1030_v62, inf }
 0x95b   :  { %v1040_v18 = vmin.f32 %v1034_v9, %v1039_v5 }
 0x95d   :  { %v1045_v40 = vmin.f32 %v1038_v37, %v1040_v18 }
 0x967   :  { %v1016_v6 = vpop.permute.xlu1 %1015 }
 0x968   :  { %v1032_v17 = vsub.f32 %v945_v59, %v1016_v6 }
 0x96a   :  { %v1043_v36 = vsel %vm757_vm6, %v1032_v17, inf }
 0x96b   :  { %v1044_v39 = vmin.f32 %v1036_v26, %v1043_v36 }
 0x96d   :  { %v1046_v42 = vmin.f32 %v1042_v38, %v1044_v39  ;;  %v1154_v39 = vld [vmem:[#allocation14 + $0xb8] sm:$0xff] }
 0x96e   :  { %1187 = vmatpush.xpose.msrb.mxu0 %v1154_v39  ;;  %1356 = vmatpush.msrb.mxu1 %v1154_v39 }
 0x96f   :  { %v1047_v43 = vmin.f32 %v1045_v40, %v1046_v42  ;;  %v1153_v40 = vld [vmem:[#allocation14 + $0xb0] sm:$0xff]  ;;  %v1152_v42 = vld [vmem:[#allocation14 + $0xa8] sm:$0xff] }
 0x970   :  { %1357 = vmatpush.msrb.mxu1 %v1153_v40 }
 0x971   :  { %v1048_v45 = vrot.slane %v1047_v43, 4 }
 0x972   :  { %1188 = vmatpush.xpose.msrb.mxu0 %v1153_v40  ;;  %1358 = vmatpush.msrb.mxu1 %v1152_v42 }
 0x973   :  { %v1049_v46 = vmin.f32 %v1047_v43, %v1048_v45  ;;  %v1151_v43 = vld [vmem:[#allocation14 + $0xa0] sm:$0xff]  ;;  %v1150_v45 = vld [vmem:[#allocation14 + $0x98] sm:$0xff] }
 0x974   :  { %1359 = vmatpush.msrb.mxu1 %v1151_v43 }
 0x975   :  { %v1050_v47 = vrot.slane %v1049_v46, 2 }
 0x976   :  { %1189 = vmatpush.xpose.msrb.mxu0 %v1152_v42  ;;  %1360 = vmatpush.msrb.mxu1 %v1150_v45 }
 0x977   :  { %v1051_v48 = vmin.f32 %v1049_v46, %v1050_v47  ;;  %v1149_v46 = vld [vmem:[#allocation14 + $0x90] sm:$0xff]  ;;  %v1148_v47 = vld [vmem:[#allocation14 + $0x88] sm:$0xff] }
 0x978   :  { %1361 = vmatpush.msrb.mxu1 %v1149_v46 }
 0x979   :  { %v1052_v49 = vrot.slane %v1051_v48, 1 }
 0x97a   :  { %1190 = vmatpush.xpose.msrb.mxu0 %v1151_v43  ;;  %1362 = vmatpush.msrb.mxu1 %v1148_v47 }
 0x97b   :  { %v1053_v50 = vmin.f32 %v1051_v48, %v1052_v49 }
 0x97d   :  { %1056 = vperm.xlu2 %1957, %v1053_v50   ;;  %v1147_v50 = vld [vmem:[#allocation14 + $0x80] sm:$0xff] }
 0x97e   :  { %1191 = vmatpush.xpose.msrb.mxu0 %v1150_v45  ;;  %1363 = vmatpush.msrb.mxu1 %v1147_v50 }
 0x982   :  { %1192 = vmatpush.xpose.msrb.mxu0 %v1149_v46 }
 0x985   :  { %1960 = vset.pattern.permute.xlu2 %v2501_v12 }
 0x986   :  { %1193 = vmatpush.xpose.msrb.mxu0 %v1148_v47 }
 0x98a   :  { %1194 = vmatpush.xpose.msrb.mxu0 %v1147_v50 }
 0x9d7   :  { %v1057_v51 = vpop.permute.xlu2 %1056 }
 0x9d8   :  { %vm1059_vm13 = vcmp.le.f32.partialorder %v1025_v0, %v1057_v51  ;;  %vm1060_vm14 = vcmp.le.f32.partialorder %v1026_v63, %v1057_v51  ;;  %vm1061_vm15 = vcmp.le.f32.partialorder %v1027_v3, %v1057_v51  ;;  %vm1062_vm0 = vcmp.le.f32.partialorder %v1028_v4, %v1057_v51 }
 0x9d9   :  { %vm1063_vm1 = vcmp.le.f32.partialorder %v1029_v2, %v1057_v51  ;;  %vm1064_vm3 = vcmp.le.f32.partialorder %v1030_v62, %v1057_v51  ;;  %vm1065_vm4 = vcmp.le.f32.partialorder %v1031_v1, %v1057_v51  ;;  %vm1066_vm5 = vcmp.le.f32.partialorder %v1032_v17, %v1057_v51 }
 0x9da   :  { %v1067_v54 = vsel %vm1059_vm13, %v2562_v21, 64  ;;  %v1068_v56 = vsel %vm1060_vm14, %v2566_v23, 64  ;;  %v1069_v55 = vsel %vm1061_vm15, %v2564_v22, 64  ;;  %v1070_v57 = vsel %vm1062_vm0, %v2570_v25, 64 }
 0x9db   :  { %v1071_v58 = vsel %vm1063_vm1, %v2590_v52, 64  ;;  %v1072_v59 = vsel %vm1064_vm3, %v2568_v32, 64  ;;  %v1073_v60 = vsel %vm1065_vm4, %v2574_v35, 64  ;;  %v1074_v61 = vsel %vm1066_vm5, %v2572_v27, 64 }
 0x9dc   :  { %v1075_v62 = vsel %vm757_vm6, %v1067_v54, 2147483647  ;;  %v1076_v53 = vsel %vm757_vm6, %v1068_v56, 2147483647  ;;  %v1077_v63 = vsel %vm757_vm6, %v1069_v55, 2147483647  ;;  %v1156_v51 = vmul.f32 %v1148_v47, %v1148_v47 }
 0x9dd   :  { %v1078_v0 = vsel %vm757_vm6, %v1070_v57, 2147483647  ;;  %v1079_v1 = vsel %vm757_vm6, %v1071_v58, 2147483647  ;;  %v1082_v2 = vsel %vm757_vm6, %v1072_v59, 2147483647  ;;  %v1155_v54 = vmul.f32 %v1147_v50, %v1147_v50 }
 0x9de   :  { %vm1080_vm7 = vcmp.lt.s32.totalorder %v1075_v62, %v1079_v1  ;;  %vm1083_vm8 = vcmp.lt.s32.totalorder %v1076_v53, %v1082_v2  ;;  %v1085_v3 = vsel %vm757_vm6, %v1073_v60, 2147483647  ;;  %v1088_v4 = vsel %vm757_vm6, %v1074_v61, 2147483647  ;;  %1165 = vadd.xlane.f32.xlu2 %v1156_v51 }
 0x9df   :  { %v1081_v5 = vsel %vm1080_vm7, %v1075_v62, %v1079_v1  ;;  %v1084_v6 = vsel %vm1083_vm8, %v1076_v53, %v1082_v2  ;;  %vm1086_vm9 = vcmp.lt.s32.totalorder %v1077_v63, %v1085_v3  ;;  %vm1089_vm10 = vcmp.lt.s32.totalorder %v1078_v0, %v1088_v4  ;;  %1163 = vadd.xlane.f32.xlu1 %v1155_v54 }
 0x9e0   :  { %v1087_v9 = vsel %vm1086_vm9, %v1077_v63, %v1085_v3  ;;  %v1090_v10 = vsel %vm1089_vm10, %v1078_v0, %v1088_v4  ;;  %vm1091_vm12 = vcmp.lt.s32.totalorder %v1081_v5, %v1084_v6  ;;  %v1157_v56 = vmul.f32 %v1149_v46, %v1149_v46 }
 0x9e1   :  { %v1092_v13 = vsel %vm1091_vm12, %v1081_v5, %v1084_v6  ;;  %vm1093_vm13 = vcmp.lt.s32.totalorder %v1087_v9, %v1090_v10  ;;  %v1159_v55 = vmul.f32 %v1151_v43, %v1151_v43  ;;  %v1158_v57 = vmul.f32 %v1150_v45, %v1150_v45 }
 0x9e2   :  { %v1094_v17 = vsel %vm1093_vm13, %v1087_v9, %v1090_v10  ;;  %v1162_v58 = vmul.f32 %v1154_v39, %v1154_v39  ;;  %v1161_v59 = vmul.f32 %v1153_v40, %v1153_v40  ;;  %v1160_v60 = vmul.f32 %v1152_v42, %v1152_v42 }
 0x9e3   :  { %vm1095_vm14 = vcmp.lt.s32.totalorder %v1092_v13, %v1094_v17 }
 0x9e4   :  { %v1096_v18 = vsel %vm1095_vm14, %v1092_v13, %v1094_v17 }
 0x9e5   :  { %v1097_v19 = vrot.slane %v1096_v18, 4 }
 0x9e6   :  { %1171 = vadd.xlane.f32.xlu2 %v1159_v55 }
 0x9e7   :  { %vm1098_vm15 = vcmp.lt.s32.totalorder %v1096_v18, %v1097_v19  ;;  %1169 = vadd.xlane.f32.xlu1 %v1158_v57 }
 0x9e8   :  { %v1099_v20 = vsel %vm1098_vm15, %v1096_v18, %v1097_v19 }
 0x9e9   :  { %v1100_v26 = vrot.slane %v1099_v20, 2 }
 0x9eb   :  { %vm1101_vm0 = vcmp.lt.s32.totalorder %v1099_v20, %v1100_v26 }
 0x9ec   :  { %v1102_v36 = vsel %vm1101_vm0, %v1099_v20, %v1100_v26 }
 0x9ed   :  { %v1103_v37 = vrot.slane %v1102_v36, 1 }
 0x9ee   :  { %1175 = vadd.xlane.f32.xlu2 %v1161_v59 }
 0x9ef   :  { %vm1104_vm1 = vcmp.lt.s32.totalorder %v1102_v36, %v1103_v37  ;;  %1173 = vadd.xlane.f32.xlu1 %v1160_v60 }
 0x9f0   :  { %v2642_v38 = vsel %vm1104_vm1, %v1102_v36, %v1103_v37 }
 0x9f1   :  { %1107 = vperm.xlu0 %1958, %v2642_v38  }
 0x9f9   :  { %1961 = vset.pattern.permute.xlu0 %v2498_v11 }
 0xa1b   :  { %1167 = vadd.xlane.f32.xlu0 %v1157_v56 }
 0xa23   :  { %1177 = vadd.xlane.f32.xlu0 %v1162_v58 }
 0xa52   :  { %v1164_v1 = vpop.xlane.xlu1 %1163 }
 0xa5a   :  { %v1170_v3 = vpop.xlane.xlu1 %1169 }
 0xa62   :  { %v1174_v5 = vpop.xlane.xlu1 %1173 }
 0xa63   :  { %v1108_v48 = vpop.permute.xlu0 %1107 }
 0xa64   :  { %vm1109_vm3 = vcmp.eq.s32.totalorder %v2530_v34, %v1108_v48 }
 0xa65   :  { %v1900_v49 = vsel %vm1109_vm3, 1.0, %v2341_v15 }
 0xa66   :  { %1901 = vmatmul.msk.f32.vlgmr.msrb.gmra.mxu2 %vm885_vm11, %v1900_v49 }
 0xa8e   :  { %v1168_v6 = vpop.xlane.xlu0 %1167 }
 0xa96   :  { %v1178_v17 = vpop.xlane.xlu0 %1177 }
 0xae9   :  { %v1132_v61 = vpop.f32.mrf.mxu2 }
 0xaea   :  { %v2650_v62 = vsub.f32 %v2606_v41, %v1132_v61  ;;  %v1166_v41 = vpop.xlane.xlu2 %1165 }
 0xaec   :  { %1195 = vmatmul.f32.vlgmr.msrb.gmra.mxu0 %v2650_v62 }
 0xaf2   :  { %v1172_v2 = vpop.xlane.xlu2 %1171 }
 0xafa   :  { %v1176_v4 = vpop.xlane.xlu2 %1175 }
 0xb69   :  { %v1196_v53 = vpop.f32.mrf.mxu0 }
 0xb6a   :  { %v1199_v63 = vmul.f32 2.0, %v1196_v53 }
 0xb6c   :  { %v1201_v0 = vperm.slane %v1199_v63, 0 }
 0xb6e   :  { %1218 = vperm.xlu0 %1961, %v1201_v0   ;;  %1212 = vperm.xlu2 %1960, %v1201_v0  }
 0xb6f   :  { %1206 = vperm.xlu1 %1959, %v1201_v0  }
 0xb76   :  { %1963 = vset.pattern.permute.xlu2 %v2520_v31  ;;  %1968 = vset.pattern.permute.xlu0 %v2340_v44 }
 0xb77   :  { %1962 = vset.pattern.permute.xlu1 %v2512_v29 }
 0xb7e   :  { %1230 = vperm.xlu2 %1963, %v1201_v0  }
 0xb7f   :  { %1224 = vperm.xlu1 %1962, %v1201_v0  }
 0xb86   :  { %1965 = vset.pattern.permute.xlu2 %v2525_v33 }
 0xb87   :  { %1964 = vset.pattern.permute.xlu1 %v2509_v28 }
 0xb8e   :  { %1242 = vperm.xlu2 %1965, %v1201_v0  }
 0xb8f   :  { %1236 = vperm.xlu1 %1964, %v1201_v0  }
 0xb96   :  { %1967 = vset.pattern.permute.xlu2 %v2340_v44 }
 0xb97   :  { %1966 = vset.pattern.permute.xlu1 %v2517_v30 }
 0xb9f   :  { %1248 = vperm.xlu1 %1966, %v1201_v0  }
 0xba7   :  { %1969 = vset.pattern.permute.xlu1 %v2494_v8 }
 0xbc8   :  { %v1213_v10 = vpop.permute.xlu2 %1212 }
 0xbc9   :  { %v1259_v37 = vsub.f32 %v1166_v41, %v1213_v10 }
 0xbcb   :  { %v1267_v47 = vsel %vm757_vm6, %v1259_v37, inf }
 0xbd8   :  { %v1231_v18 = vpop.permute.xlu2 %1230 }
 0xbd9   :  { %v1262_v8 = vsub.f32 %v1172_v2, %v1231_v18 }
 0xbdb   :  { %v1270_v54 = vsel %vm757_vm6, %v1262_v8, inf }
 0xbe0   :  { %v1219_v36 = vpop.permute.xlu0 %1218 }
 0xbe1   :  { %v1207_v9 = vpop.permute.xlu1 %1206  ;;  %v1260_v42 = vsub.f32 %v1168_v6, %v1219_v36 }
 0xbe2   :  { %v1258_v39 = vsub.f32 %v1164_v1, %v1207_v9 }
 0xbe3   :  { %v1268_v56 = vsel %vm757_vm6, %v1260_v42, inf }
 0xbe4   :  { %v1266_v48 = vsel %vm757_vm6, %v1258_v39, inf }
 0xbe5   :  { %v1271_v58 = vmin.f32 %v1266_v48, %v1270_v54 }
 0xbe8   :  { %v1243_v20 = vpop.permute.xlu2 %1242 }
 0xbe9   :  { %v1264_v40 = vsub.f32 %v1176_v4, %v1243_v20 }
 0xbeb   :  { %v1274_v49 = vsel %vm757_vm6, %v1264_v40, inf }
 0xbec   :  { %v1275_v59 = vmin.f32 %v1268_v56, %v1274_v49 }
 0xbf1   :  { %v1225_v13 = vpop.permute.xlu1 %1224 }
 0xbf2   :  { %v1261_v43 = vsub.f32 %v1170_v3, %v1225_v13 }
 0xbf4   :  { %v1269_v55 = vsel %vm757_vm6, %v1261_v43, inf }
 0xc01   :  { %v1237_v19 = vpop.permute.xlu1 %1236 }
 0xc02   :  { %v1263_v26 = vsub.f32 %v1174_v5, %v1237_v19 }
 0xc04   :  { %v1272_v45 = vsel %vm757_vm6, %v1263_v26, inf }
 0xc05   :  { %v1273_v51 = vmin.f32 %v1267_v47, %v1272_v45 }
 0xc07   :  { %v1278_v61 = vmin.f32 %v1271_v58, %v1273_v51 }
 0xc11   :  { %v1249_v46 = vpop.permute.xlu1 %1248 }
 0xc12   :  { %v1265_v50 = vsub.f32 %v1178_v17, %v1249_v46 }
 0xc14   :  { %v1276_v57 = vsel %vm757_vm6, %v1265_v50, inf }
 0xc15   :  { %v1277_v60 = vmin.f32 %v1269_v55, %v1276_v57 }
 0xc17   :  { %v1279_v53 = vmin.f32 %v1275_v59, %v1277_v60  ;;  %v1387_v59 = vld [vmem:[#allocation14 + $0xf8] sm:$0xff]  ;;  %v1386_v60 = vld [vmem:[#allocation14 + $0xf0] sm:$0xff] }
 0xc18   :  { %1420 = vmatpush.xpose.msra.mxu2 %v1387_v59 }
 0xc19   :  { %v1280_v63 = vmin.f32 %v1278_v61, %v1279_v53  ;;  %v1385_v61 = vld [vmem:[#allocation14 + $0xe8] sm:$0xff]  ;;  %v1384_v53 = vld [vmem:[#allocation14 + $0xe0] sm:$0xff] }
 0xc1b   :  { %v1281_v0 = vrot.slane %v1280_v63, 4 }
 0xc1c   :  { %1421 = vmatpush.xpose.msra.mxu2 %v1386_v60 }
 0xc1d   :  { %v1282_v41 = vmin.f32 %v1280_v63, %v1281_v0  ;;  %v1383_v63 = vld [vmem:[#allocation14 + $0xd8] sm:$0xff]  ;;  %v1382_v0 = vld [vmem:[#allocation14 + $0xd0] sm:$0xff] }
 0xc1f   :  { %v1283_v1 = vrot.slane %v1282_v41, 2 }
 0xc20   :  { %1422 = vmatpush.xpose.msra.mxu2 %v1385_v61 }
 0xc21   :  { %v1284_v2 = vmin.f32 %v1282_v41, %v1283_v1  ;;  %v1381_v41 = vld [vmem:[#allocation14 + $0xc8] sm:$0xff] }
 0xc23   :  { %v1285_v3 = vrot.slane %v1284_v2, 1 }
 0xc24   :  { %1423 = vmatpush.xpose.msra.mxu2 %v1384_v53 }
 0xc25   :  { %v1286_v4 = vmin.f32 %v1284_v2, %v1285_v3  ;;  %v1389_v3 = vmul.f32 %v1381_v41, %v1381_v41 }
 0xc27   :  { %1289 = vperm.xlu2 %1967, %v1286_v4  }
 0xc28   :  { %1424 = vmatpush.xpose.msra.mxu2 %v1383_v63 }
 0xc2c   :  { %1425 = vmatpush.xpose.msra.mxu2 %v1382_v0 }
 0xc2f   :  { %1970 = vset.pattern.permute.xlu2 %v2501_v12 }
 0xc30   :  { %1426 = vmatpush.xpose.msra.mxu2 %v1381_v41 }
 0xc50   :  { %1398 = vadd.xlane.f32.xlu2 %v1389_v3 }
 0xc81   :  { %v1290_v5 = vpop.permute.xlu2 %1289 }
 0xc82   :  { %vm1292_vm4 = vcmp.le.f32.partialorder %v1258_v39, %v1290_v5  ;;  %vm1293_vm5 = vcmp.le.f32.partialorder %v1259_v37, %v1290_v5  ;;  %vm1294_vm7 = vcmp.le.f32.partialorder %v1260_v42, %v1290_v5  ;;  %vm1295_vm8 = vcmp.le.f32.partialorder %v1261_v43, %v1290_v5 }
 0xc83   :  { %vm1296_vm9 = vcmp.le.f32.partialorder %v1262_v8, %v1290_v5  ;;  %vm1297_vm10 = vcmp.le.f32.partialorder %v1263_v26, %v1290_v5  ;;  %vm1298_vm12 = vcmp.le.f32.partialorder %v1264_v40, %v1290_v5  ;;  %vm1299_vm13 = vcmp.le.f32.partialorder %v1265_v50, %v1290_v5 }
 0xc84   :  { %v1300_v6 = vsel %vm1292_vm4, %v2562_v21, 64  ;;  %v1301_v9 = vsel %vm1293_vm5, %v2566_v23, 64  ;;  %v1302_v10 = vsel %vm1294_vm7, %v2564_v22, 64  ;;  %v1303_v13 = vsel %vm1295_vm8, %v2570_v25, 64 }
 0xc85   :  { %v1304_v17 = vsel %vm1296_vm9, %v2590_v52, 64  ;;  %v1305_v12 = vsel %vm1297_vm10, %v2568_v32, 64  ;;  %v1306_v18 = vsel %vm1298_vm12, %v2574_v35, 64  ;;  %v1307_v19 = vsel %vm1299_vm13, %v2572_v27, 64 }
 0xc86   :  { %v1308_v20 = vsel %vm757_vm6, %v1300_v6, 2147483647  ;;  %v1309_v26 = vsel %vm757_vm6, %v1301_v9, 2147483647  ;;  %v1310_v36 = vsel %vm757_vm6, %v1302_v10, 2147483647  ;;  %v1390_v5 = vmul.f32 %v1382_v0, %v1382_v0 }
 0xc87   :  { %v1311_v37 = vsel %vm757_vm6, %v1303_v13, 2147483647  ;;  %v1312_v39 = vsel %vm757_vm6, %v1304_v17, 2147483647  ;;  %v1315_v40 = vsel %vm757_vm6, %v1305_v12, 2147483647  ;;  %v1392_v6 = vmul.f32 %v1384_v53, %v1384_v53 }
 0xc88   :  { %vm1313_vm14 = vcmp.lt.s32.totalorder %v1308_v20, %v1312_v39  ;;  %vm1316_vm15 = vcmp.lt.s32.totalorder %v1309_v26, %v1315_v40  ;;  %v1318_v8 = vsel %vm757_vm6, %v1306_v18, 2147483647  ;;  %v1321_v42 = vsel %vm757_vm6, %v1307_v19, 2147483647 }
 0xc89   :  { %v1314_v43 = vsel %vm1313_vm14, %v1308_v20, %v1312_v39  ;;  %v1317_v45 = vsel %vm1316_vm15, %v1309_v26, %v1315_v40  ;;  %vm1319_vm0 = vcmp.lt.s32.totalorder %v1310_v36, %v1318_v8  ;;  %vm1322_vm1 = vcmp.lt.s32.totalorder %v1311_v37, %v1321_v42  ;;  %1404 = vadd.xlane.f32.xlu2 %v1392_v6 }
 0xc8a   :  { %v1320_v46 = vsel %vm1319_vm0, %v1310_v36, %v1318_v8  ;;  %v1323_v47 = vsel %vm1322_vm1, %v1311_v37, %v1321_v42  ;;  %vm1324_vm3 = vcmp.lt.s32.totalorder %v1314_v43, %v1317_v45  ;;  %v1391_v9 = vmul.f32 %v1383_v63, %v1383_v63 }
 0xc8b   :  { %v1325_v48 = vsel %vm1324_vm3, %v1314_v43, %v1317_v45  ;;  %vm1326_vm4 = vcmp.lt.s32.totalorder %v1320_v46, %v1323_v47  ;;  %v1395_v10 = vmul.f32 %v1387_v59, %v1387_v59  ;;  %v1394_v13 = vmul.f32 %v1386_v60, %v1386_v60 }
 0xc8c   :  { %v1327_v49 = vsel %vm1326_vm4, %v1320_v46, %v1323_v47  ;;  %v1393_v17 = vmul.f32 %v1385_v61, %v1385_v61  ;;  %v1136_v36 = vadd.s32 64, %v2642_v38 }
 0xc8d   :  { %vm1328_vm5 = vcmp.lt.s32.totalorder %v1325_v48, %v1327_v49 }
 0xc8e   :  { %v1329_v50 = vsel %vm1328_vm5, %v1325_v48, %v1327_v49 }
 0xc8f   :  { %v1330_v51 = vrot.slane %v1329_v50, 4 }
 0xc91   :  { %vm1331_vm7 = vcmp.lt.s32.totalorder %v1329_v50, %v1330_v51  ;;  %1408 = vadd.xlane.f32.xlu2 %v1394_v13 }
 0xc92   :  { %v1332_v54 = vsel %vm1331_vm7, %v1329_v50, %v1330_v51 }
 0xc93   :  { %v1333_v56 = vrot.slane %v1332_v54, 2 }
 0xc95   :  { %vm1334_vm8 = vcmp.lt.s32.totalorder %v1332_v54, %v1333_v56 }
 0xc96   :  { %v1335_v55 = vsel %vm1334_vm8, %v1332_v54, %v1333_v56 }
 0xc97   :  { %v1336_v57 = vrot.slane %v1335_v55, 1 }
 0xc99   :  { %vm1337_vm9 = vcmp.lt.s32.totalorder %v1335_v55, %v1336_v57 }
 0xc9a   :  { %v1338_v58 = vsel %vm1337_vm9, %v1335_v55, %v1336_v57 }
 0xc9b   :  { %1340 = vperm.xlu0 %1968, %v1338_v58   ;;  %v1369_v38 = vadd.s32 128, %v1338_v58 }
 0xca3   :  { %1971 = vset.pattern.permute.xlu0 %v2498_v11  ;;  %v1380_v11 = vld [vmem:[#allocation14 + $0xc0] sm:$0xff] }
 0xca4   :  { %1427 = vmatpush.xpose.msra.mxu2 %v1380_v11  ;;  %v1388_v4 = vmul.f32 %v1380_v11, %v1380_v11 }
 0xca6   :  { %1396 = vadd.xlane.f32.xlu1 %v1388_v4 }
 0xcae   :  { %1402 = vadd.xlane.f32.xlu1 %v1391_v9 }
 0xcb6   :  { %1406 = vadd.xlane.f32.xlu1 %v1393_v17 }
 0xcc5   :  { %1400 = vadd.xlane.f32.xlu0 %v1390_v5 }
 0xccd   :  { %1410 = vadd.xlane.f32.xlu0 %v1395_v10 }
 0xd0d   :  { %v1341_v1 = vpop.permute.xlu0 %1340 }
 0xd0e   :  { %vm1342_vm10 = vcmp.eq.s32.totalorder %v2530_v34, %v1341_v1 }
 0xd0f   :  { %v1904_v2 = vsel %vm1342_vm10, 1.0, %v2341_v15 }
 0xd10   :  { %1905 = vmatmul.msk.f32.vlgmr.msrb.gmra.mxu1 %vm885_vm11, %v1904_v2 }
 0xd8d   :  { %v1365_v12 = vpop.f32.mrf.mxu1 }
 0xd8e   :  { %v1368_v18 = vsub.f32 %v2650_v62, %v1365_v12 }
 0xd90   :  { %1428 = vmatmul.f32.vlgmr.msra.gmra.mxu2 %v1368_v18 }
 0xe13   :  { %v1429_v19 = vpop.f32.mrf.mxu2 }
 0xe14   :  { %v1432_v20 = vmul.f32 2.0, %v1429_v19  ;;  %v1605_v19 = vld [vmem:[#allocation16 + $0x78] sm:$0xff] }
 0xe15   :  { %1622 = vmatpush.msrb.mxu3 %v1605_v19 }
 0xe16   :  { %v1434_v26 = vperm.slane %v1432_v20, 0  ;;  %v1621_v20 = vld [vmem:[#allocation16 + $0xf8] sm:$0xff] }
 0xe17   :  { %1642 = vmatpush.msra.mxu1 %v1621_v20  ;;  %v1591_v20 = vld [vmem:[#allocation16 + $0x8] sm:$0xff] }
 0xe18   :  { %1451 = vperm.xlu0 %1971, %v1434_v26   ;;  %1445 = vperm.xlu2 %1970, %v1434_v26  }
 0xe19   :  { %1439 = vperm.xlu1 %1969, %v1434_v26  }
 0xe20   :  { %1978 = vset.pattern.permute.xlu0 %v2340_v44  ;;  %1973 = vset.pattern.permute.xlu2 %v2520_v31  ;;  %v1399_v31 = vpop.xlane.xlu2 %1398 }
 0xe21   :  { %1972 = vset.pattern.permute.xlu1 %v2512_v29  ;;  %1138 = vperm.xlu0 %1978, %v1136_v36   ;;  %v1397_v29 = vpop.xlane.xlu1 %1396  ;;  %v1620_v36 = vld [vmem:[#allocation16 + $0xf0] sm:$0xff] }
 0xe22   :  { %1643 = vmatpush.msra.mxu1 %v1620_v36  ;;  %v1590_v36 = vld [vmem:[#allocation16] sm:$0xff] }
 0xe28   :  { %1463 = vperm.xlu2 %1973, %v1434_v26   ;;  %v1405_v62 = vpop.xlane.xlu2 %1404 }
 0xe29   :  { %1457 = vperm.xlu1 %1972, %v1434_v26   ;;  %v1403_v37 = vpop.xlane.xlu1 %1402 }
 0xe30   :  { %1975 = vset.pattern.permute.xlu2 %v2525_v33  ;;  %v1409_v39 = vpop.xlane.xlu2 %1408  ;;  %v1401_v33 = vpop.xlane.xlu0 %1400 }
 0xe31   :  { %1974 = vset.pattern.permute.xlu1 %v2509_v28  ;;  %v1407_v40 = vpop.xlane.xlu1 %1406 }
 0xe38   :  { %1475 = vperm.xlu2 %1975, %v1434_v26   ;;  %v1411_v43 = vpop.xlane.xlu0 %1410 }
 0xe39   :  { %1469 = vperm.xlu1 %1974, %v1434_v26  }
 0xe40   :  { %1977 = vset.pattern.permute.xlu2 %v2340_v44 }
 0xe41   :  { %1976 = vset.pattern.permute.xlu1 %v2517_v30 }
 0xe49   :  { %1481 = vperm.xlu1 %1976, %v1434_v26   ;;  %v1604_v26 = vld [vmem:[#allocation16 + $0x70] sm:$0xff] }
 0xe4a   :  { %1623 = vmatpush.msrb.mxu3 %v1604_v26  ;;  %v1607_v26 = vld [vmem:[#allocation16 + $0x88] sm:$0xff] }
 0xe51   :  { %1979 = vset.pattern.permute.xlu1 %v2340_v44 }
 0xe52   :  { %1371 = vperm.xlu1 %1979, %v1369_v38   ;;  %v1603_v38 = vld [vmem:[#allocation16 + $0x68] sm:$0xff] }
 0xe53   :  { %1624 = vmatpush.msrb.mxu3 %v1603_v38  ;;  %v1606_v38 = vld [vmem:[#allocation16 + $0x80] sm:$0xff] }
 0xe72   :  { %v1446_v28 = vpop.permute.xlu2 %1445 }
 0xe73   :  { %v1492_v49 = vsub.f32 %v1399_v31, %v1446_v28  ;;  %v1619_v31 = vld [vmem:[#allocation16 + $0xe8] sm:$0xff] }
 0xe74   :  { %1644 = vmatpush.msra.mxu1 %v1619_v31  ;;  %v1710_v31 = vld [vmem:[#allocation17 + $0xf0] sm:$0xff] }
 0xe75   :  { %v1500_v58 = vsel %vm757_vm6, %v1492_v49, inf  ;;  %1712 = vmatpush.msra.mxu0 %v1710_v31 }
 0xe82   :  { %v1464_v45 = vpop.permute.xlu2 %1463 }
 0xe83   :  { %v1495_v51 = vsub.f32 %v1405_v62, %v1464_v45  ;;  %v1602_v62 = vld [vmem:[#allocation16 + $0x60] sm:$0xff] }
 0xe84   :  { %1625 = vmatpush.msrb.mxu3 %v1602_v62  ;;  %v1708_v62 = vld [vmem:[#allocation17 + $0xe0] sm:$0xff] }
 0xe85   :  { %v1503_v63 = vsel %vm757_vm6, %v1495_v51, inf  ;;  %1713 = vmatpush.msra.mxu0 %v1708_v62  ;;  %v1773_v62 = vld [vmem:[#allocation19 + $0x48] sm:$0xff] }
 0xe8a   :  { %v1452_v48 = vpop.permute.xlu0 %1451 }
 0xe8b   :  { %v1440_v8 = vpop.permute.xlu1 %1439  ;;  %v1493_v54 = vsub.f32 %v1401_v33, %v1452_v48  ;;  %v1616_v48 = vld [vmem:[#allocation16 + $0xd0] sm:$0xff] }
 0xe8c   :  { %v1491_v44 = vsub.f32 %v1397_v29, %v1440_v8 }
 0xe8d   :  { %v1501_v0 = vsel %vm757_vm6, %v1493_v54, inf }
 0xe8e   :  { %v1499_v59 = vsel %vm757_vm6, %v1491_v44, inf }
 0xe8f   :  { %v1504_v2 = vmin.f32 %v1499_v59, %v1503_v63  ;;  %v1597_v59 = vld [vmem:[#allocation16 + $0x38] sm:$0xff] }
 0xe92   :  { %v1476_v47 = vpop.permute.xlu2 %1475 }
 0xe93   :  { %v1497_v50 = vsub.f32 %v1409_v39, %v1476_v47  ;;  %v1601_v39 = vld [vmem:[#allocation16 + $0x58] sm:$0xff] }
 0xe94   :  { %1626 = vmatpush.msrb.mxu3 %v1601_v39  ;;  %v1706_v39 = vld [vmem:[#allocation17 + $0xd0] sm:$0xff] }
 0xe95   :  { %v1507_v60 = vsel %vm757_vm6, %v1497_v50, inf  ;;  %1714 = vmatpush.msra.mxu0 %v1706_v39 }
 0xe96   :  { %v1508_v11 = vmin.f32 %v1501_v0, %v1507_v60  ;;  %v1612_v0 = vld [vmem:[#allocation16 + $0xb0] sm:$0xff] }
 0xe9b   :  { %v1458_v42 = vpop.permute.xlu1 %1457 }
 0xe9c   :  { %v1494_v56 = vsub.f32 %v1403_v37, %v1458_v42  ;;  %v1618_v37 = vld [vmem:[#allocation16 + $0xe0] sm:$0xff]  ;;  %v1617_v42 = vld [vmem:[#allocation16 + $0xd8] sm:$0xff] }
 0xe9d   :  { %1645 = vmatpush.msra.mxu1 %v1618_v37  ;;  %v1709_v37 = vld [vmem:[#allocation17 + $0xe8] sm:$0xff] }
 0xe9e   :  { %v1502_v41 = vsel %vm757_vm6, %v1494_v56, inf }
 0xe9f   :  { %1646 = vmatpush.msra.mxu1 %v1617_v42 }
 0xea1   :  { %1647 = vmatpush.msra.mxu1 %v1616_v48 }
 0xeab   :  { %v1470_v46 = vpop.permute.xlu1 %1469 }
 0xeac   :  { %v2700_v30 = vsub.f32 %v1407_v40, %v1470_v46 }
 0xeae   :  { %v1505_v55 = vsel %vm757_vm6, %v2700_v30, inf }
 0xeaf   :  { %v1506_v53 = vmin.f32 %v1500_v58, %v1505_v55 }
 0xeb1   :  { %v1511_v4 = vmin.f32 %v1504_v2, %v1506_v53  ;;  %v1596_v53 = vld [vmem:[#allocation16 + $0x30] sm:$0xff]  ;;  %v1611_v2 = vld [vmem:[#allocation16 + $0xa8] sm:$0xff] }
 0xebb   :  { %v1482_v57 = vpop.permute.xlu1 %1481 }
 0xebc   :  { %v1498_v61 = vsub.f32 %v1411_v43, %v1482_v57  ;;  %v1600_v43 = vld [vmem:[#allocation16 + $0x50] sm:$0xff]  ;;  %v1614_v57 = vld [vmem:[#allocation16 + $0xc0] sm:$0xff] }
 0xebd   :  { %1627 = vmatpush.msrb.mxu3 %v1600_v43 }
 0xebe   :  { %v1509_v1 = vsel %vm757_vm6, %v1498_v61, inf }
 0xebf   :  { %v1510_v3 = vmin.f32 %v1502_v41, %v1509_v1  ;;  %v1595_v1 = vld [vmem:[#allocation16 + $0x28] sm:$0xff] }
 0xec1   :  { %v1512_v5 = vmin.f32 %v1508_v11, %v1510_v3  ;;  %v1594_v11 = vld [vmem:[#allocation16 + $0x20] sm:$0xff] }
 0xec3   :  { %v1513_v6 = vmin.f32 %v1511_v4, %v1512_v5  ;;  %v1610_v4 = vld [vmem:[#allocation16 + $0xa0] sm:$0xff] }
 0xec5   :  { %v1514_v9 = vrot.slane %v1513_v6, 4 }
 0xec7   :  { %v1515_v10 = vmin.f32 %v1513_v6, %v1514_v9  ;;  %v1593_v6 = vld [vmem:[#allocation16 + $0x18] sm:$0xff] }
 0xec8   :  { %v1609_v9 = vld [vmem:[#allocation16 + $0x98] sm:$0xff] }
 0xec9   :  { %v1516_v13 = vrot.slane %v1515_v10, 2 }
 0xecb   :  { %v1517_v17 = vmin.f32 %v1515_v10, %v1516_v13  ;;  %v1592_v10 = vld [vmem:[#allocation16 + $0x10] sm:$0xff] }
 0xecd   :  { %v1518_v12 = vrot.slane %v1517_v17, 1 }
 0xecf   :  { %v1519_v18 = vmin.f32 %v1517_v17, %v1518_v12  ;;  %v1608_v17 = vld [vmem:[#allocation16 + $0x90] sm:$0xff] }
 0xed1   :  { %1522 = vperm.xlu2 %1977, %v1519_v18  }
 0xf2b   :  { %v1523_v29 = vpop.permute.xlu2 %1522 }
 0xf2c   :  { %vm1525_vm11 = vcmp.le.f32.partialorder %v1491_v44, %v1523_v29  ;;  %vm1526_vm12 = vcmp.le.f32.partialorder %v1492_v49, %v1523_v29  ;;  %vm1527_vm13 = vcmp.le.f32.partialorder %v1493_v54, %v1523_v29  ;;  %vm1528_vm14 = vcmp.le.f32.partialorder %v1494_v56, %v1523_v29  ;;  %v1615_v44 = vld [vmem:[#allocation16 + $0xc8] sm:$0xff]  ;;  %v1598_v54 = vld [vmem:[#allocation16 + $0x40] sm:$0xff] }
 0xf2d   :  { %vm1529_vm15 = vcmp.le.f32.partialorder %v1495_v51, %v1523_v29  ;;  %vm1530_vm0 = vcmp.le.f32.partialorder %v2700_v30, %v1523_v29  ;;  %vm1531_vm1 = vcmp.le.f32.partialorder %v1497_v50, %v1523_v29  ;;  %vm1532_vm3 = vcmp.le.f32.partialorder %v1498_v61, %v1523_v29  ;;  %1648 = vmatpush.msra.mxu1 %v1615_v44  ;;  %v1613_v61 = vld [vmem:[#allocation16 + $0xb8] sm:$0xff]  ;;  %v1700_v44 = vld [vmem:[#allocation17 + $0xa0] sm:$0xff] }
 0xf2e   :  { %v1533_v40 = vsel %vm1525_vm11, %v2562_v21, 64  ;;  %v1534_v33 = vsel %vm1526_vm12, %v2566_v23, 64  ;;  %v1535_v8 = vsel %vm1527_vm13, %v2564_v22, 64  ;;  %v1536_v28 = vsel %vm1528_vm14, %v2570_v25, 64  ;;  %v1599_v21 = vld [vmem:[#allocation16 + $0x48] sm:$0xff]  ;;  %v1711_v29 = vld [vmem:[#allocation17 + $0xf8] sm:$0xff] }
 0xf2f   :  { %v1537_v45 = vsel %vm1529_vm15, %v2590_v52, 64  ;;  %v1538_v46 = vsel %vm1530_vm0, %v2568_v32, 64  ;;  %v1539_v47 = vsel %vm1531_vm1, %v2574_v35, 64  ;;  %v1540_v30 = vsel %vm1532_vm3, %v2572_v27, 64  ;;  %1628 = vmatpush.msrb.mxu3 %v1599_v21  ;;  %1649 = vmatpush.msra.mxu1 %v1614_v57  ;;  %v1692_v57 = vld [vmem:[#allocation17 + $0x60] sm:$0xff] }
 0xf30   :  { %v1541_v23 = vsel %vm757_vm6, %v1533_v40, 2147483647  ;;  %v1542_v22 = vsel %vm757_vm6, %v1534_v33, 2147483647  ;;  %v1543_v25 = vsel %vm757_vm6, %v1535_v8, 2147483647  ;;  %1732 = vmatpush.msrb.mxu2 %v1711_v29  ;;  %v1139_v33 = vpop.permute.xlu0 %1138 }
 0xf31   :  { %v1544_v49 = vsel %vm757_vm6, %v1536_v28, 2147483647  ;;  %v1545_v52 = vsel %vm757_vm6, %v1537_v45, 2147483647  ;;  %v1548_v32 = vsel %vm757_vm6, %v1538_v46, 2147483647  ;;  %1629 = vmatpush.msrb.mxu3 %v1598_v54  ;;  %1650 = vmatpush.msra.mxu1 %v1613_v61  ;;  %v1372_v28 = vpop.permute.xlu1 %1371  ;;  %vm1140_vm14 = vcmp.eq.s32.totalorder %v2530_v34, %v1139_v33 }
 0xf32   :  { %vm1546_vm4 = vcmp.lt.s32.totalorder %v1541_v23, %v1545_v52  ;;  %vm1549_vm5 = vcmp.lt.s32.totalorder %v1542_v22, %v1548_v32  ;;  %v1551_v27 = vsel %vm757_vm6, %v1539_v47, 2147483647  ;;  %v1554_v35 = vsel %vm757_vm6, %v1540_v30, 2147483647  ;;  %v1707_v40 = vld [vmem:[#allocation17 + $0xd8] sm:$0xff]  ;;  %1733 = vmatpush.msrb.mxu2 %v1709_v37  ;;  %v1697_v54 = vld [vmem:[#allocation17 + $0x88] sm:$0xff] }
 0xf33   :  { %v1547_v50 = vsel %vm1546_vm4, %v1541_v23, %v1545_v52  ;;  %v1550_v51 = vsel %vm1549_vm5, %v1542_v22, %v1548_v32  ;;  %vm1552_vm7 = vcmp.lt.s32.totalorder %v1543_v25, %v1551_v27  ;;  %vm1555_vm8 = vcmp.lt.s32.totalorder %v1544_v49, %v1554_v35  ;;  %1630 = vmatpush.msrb.mxu3 %v1597_v59  ;;  %v1704_v32 = vld [vmem:[#allocation17 + $0xc0] sm:$0xff]  ;;  %v1690_v59 = vld [vmem:[#allocation17 + $0x50] sm:$0xff]  ;;  %v1789_v37 = vld [vmem:[#allocation19 + $0xc8] sm:$0xff] }
 0xf34   :  { %v1553_v56 = vsel %vm1552_vm7, %v1543_v25, %v1551_v27  ;;  %v1556_v55 = vsel %vm1555_vm8, %v1544_v49, %v1554_v35  ;;  %vm1557_vm9 = vcmp.lt.s32.totalorder %v1547_v50, %v1550_v51  ;;  %1651 = vmatpush.msra.mxu1 %v1612_v0  ;;  %1734 = vmatpush.msrb.mxu2 %v1707_v40  ;;  %v637_v8 = vadd.s32 128, %v2530_v34  ;;  %v1705_v27 = vld [vmem:[#allocation17 + $0xc8] sm:$0xff]  ;;  %v1702_v35 = vld [vmem:[#allocation17 + $0xb0] sm:$0xff]  ;;  %v1688_v61 = vld [vmem:[#allocation17 + $0x40] sm:$0xff] }
 0xf35   :  { %v1558_v58 = vsel %vm1557_vm9, %v1547_v50, %v1550_v51  ;;  %vm1559_vm10 = vcmp.lt.s32.totalorder %v1553_v56, %v1556_v55  ;;  %1631 = vmatpush.msrb.mxu3 %v1596_v53  ;;  %vm1373_vm0 = vcmp.eq.s32.totalorder %v2530_v34, %v1372_v28  ;;  %v1902_v42 = vsel %vm1140_vm14, 1.0, %v2341_v15  ;;  %1715 = vmatpush.msra.mxu0 %v1704_v32  ;;  %v1701_v50 = vld [vmem:[#allocation17 + $0xa8] sm:$0xff]  ;;  %v1699_v51 = vld [vmem:[#allocation17 + $0x98] sm:$0xff]  ;;  %v1790_v29 = vld [vmem:[#allocation19 + $0xd0] sm:$0xff] }
 0xf36   :  { %v1560_v60 = vsel %vm1559_vm10, %v1553_v56, %v1556_v55  ;;  %1652 = vmatpush.msra.mxu1 %v1611_v2  ;;  %vm1141_vm15 = vcmp.eq.s32.totalorder %v637_v8, %v1139_v33  ;;  %vm1374_vm1 = vcmp.eq.s32.totalorder %v637_v8, %v1372_v28  ;;  %vm910_vm3 = vcmp.eq.s32.totalorder %v637_v8, %v2596_v14  ;;  %v1694_v56 = vld [vmem:[#allocation17 + $0x70] sm:$0xff]  ;;  %v1695_v55 = vld [vmem:[#allocation17 + $0x78] sm:$0xff]  ;;  %v1689_v53 = vld [vmem:[#allocation17 + $0x48] sm:$0xff] }
 0xf37   :  { %vm1561_vm6 = vcmp.lt.s32.totalorder %v1558_v58, %v1560_v60  ;;  %1632 = vmatpush.msrb.mxu3 %v1595_v1  ;;  %v1903_v43 = vsel %vm1141_vm15, 1.0, %v2341_v15  ;;  %vm1584_vm4 = vcmask 1041408   ;;  %v1906_v45 = vsel %vm1373_vm0, 1.0, %v2341_v15  ;;  %1735 = vmatpush.msrb.mxu2 %v1705_v27  ;;  %v1687_v0 = vld [vmem:[#allocation17 + $0x38] sm:$0xff]  ;;  %v1685_v1 = vld [vmem:[#allocation17 + $0x28] sm:$0xff]  ;;  %v1682_v2 = vld [vmem:[#allocation17 + $0x10] sm:$0xff] }
 0xf38   :  { %v1562_v63 = vsel %vm1561_vm6, %v1558_v58, %v1560_v60  ;;  %1653 = vmatpush.msra.mxu1 %v1610_v4  ;;  %v1907_v46 = vsel %vm1374_vm1, 1.0, %v2341_v15  ;;  %v1899_v47 = vsel %vm910_vm3, 1.0, %v2341_v15  ;;  %vm1587_vm5 = vcmask 1042432   ;;  %1716 = vmatpush.msra.mxu0 %v1702_v35  ;;  %v1693_v58 = vld [vmem:[#allocation17 + $0x68] sm:$0xff]  ;;  %v1691_v60 = vld [vmem:[#allocation17 + $0x58] sm:$0xff]  ;;  %v1772_v33 = vld [vmem:[#allocation19 + $0x40] sm:$0xff] }
 0xf39   :  { %v1563_v41 = vrot.slane %v1562_v63, 4  ;;  %1633 = vmatpush.msrb.mxu3 %v1594_v11  ;;  %v1582_v48 = vsel %vm619_vm2, %v2601_v16, %v1902_v42  ;;  %v1583_v21 = vsel %vm619_vm2, %v1899_v47, %v1903_v43  ;;  %v1703_v16 = vld [vmem:[#allocation17 + $0xb8] sm:$0xff]  ;;  %v1681_v4 = vld [vmem:[#allocation17 + $0x8] sm:$0xff]  ;;  %vm1662_vm9 = vcmask 1043456   ;;  %v1788_v42 = vld [vmem:[#allocation19 + $0xc0] sm:$0xff] }
 0xf3a   :  { %1654 = vmatpush.msra.mxu1 %v1609_v9  ;;  %v1585_v14 = vsel %vm1584_vm4, %v1582_v48, %v1906_v45  ;;  %v1586_v23 = vsel %vm1584_vm4, %v1583_v21, %v1907_v46  ;;  %1736 = vmatpush.msrb.mxu2 %v1703_v16  ;;  %v1683_v11 = vld [vmem:[#allocation17 + $0x18] sm:$0xff]  ;;  %v1778_v9 = vld [vmem:[#allocation19 + $0x70] sm:$0xff]  ;;  %v1678_v35 = vld [vmem:[%s2758_s1] sm:$0x1]  ;;  %vm1761_vm6 = vcmp.lt.s32.totalorder %v635_v7, 256  ;;  %s2343_s1 = smov [#allocation20]  }
 0xf3b   :  { %vm1564_vm11 = vcmp.lt.s32.totalorder %v1562_v63, %v1563_v41  ;;  %1634 = vmatpush.msrb.mxu3 %v1593_v6  ;;  %1717 = vmatpush.msra.mxu0 %v1700_v44  ;;  %v1779_v6 = vld [vmem:[#allocation19 + $0x78] sm:$0xff]  ;;  %s1863_s26 = sshll.u32 %s2343_s1, 4  ;;  %vm1856_vm14 = vcmask 0   ;;  %s1864_s26 = int_to_ptr.vmem [resolvable:$true] %s1863_s26 }
 0xf3c   :  { %v1565_v3 = vsel %vm1564_vm11, %v1562_v63, %v1563_v41  ;;  %1655 = vmatpush.msra.mxu1 %v1608_v17  ;;  %1737 = vmatpush.msrb.mxu2 %v1701_v50  ;;  %v1686_v63 = vld [vmem:[#allocation17 + $0x30] sm:$0xff]  ;;  %v1684_v41 = vld [vmem:[#allocation17 + $0x20] sm:$0xff]  ;;  %v1771_v43 = vld [vmem:[#allocation19 + $0x38] sm:$0xff] }
 0xf3d   :  { %v1566_v5 = vrot.slane %v1565_v3, 2  ;;  %1635 = vmatpush.msrb.mxu3 %v1592_v10  ;;  %v1795_v10 = vld [vmem:[#allocation19 + $0xf8] sm:$0xff]  ;;  %v1794_v17 = vld [vmem:[#allocation19 + $0xf0] sm:$0xff] }
 0xf3e   :  { %1656 = vmatpush.msra.mxu1 %v1607_v26  ;;  %1738 = vmatpush.msrb.mxu2 %v1699_v51  ;;  %v1775_v26 = vld [vmem:[#allocation19 + $0x58] sm:$0xff]  ;;  %v1766_v51 = vld [vmem:[#allocation19 + $0x10] sm:$0xff] }
 0xf3f   :  { %vm1567_vm12 = vcmp.lt.s32.totalorder %v1565_v3, %v1566_v5  ;;  %1636 = vmatpush.msrb.mxu3 %v1591_v20  ;;  %v1787_v46 = vld [vmem:[#allocation19 + $0xb8] sm:$0xff] }
 0xf40   :  { %v1568_v13 = vsel %vm1567_vm12, %v1565_v3, %v1566_v5  ;;  %1657 = vmatpush.msra.mxu1 %v1606_v38  ;;  %1739 = vmatpush.msrb.mxu2 %v1697_v54  ;;  %v1680_v3 = vld [vmem:[#allocation17] sm:$0xff]  ;;  %v2342_v5 = vmov 4.0   ;;  %v1774_v38 = vld [vmem:[#allocation19 + $0x50] sm:$0xff]  ;;  %v1767_v50 = vld [vmem:[#allocation19 + $0x18] sm:$0xff] }
 0xf41   :  { %v1569_v12 = vrot.slane %v1568_v13, 1  ;;  %1637 = vmatpush.msrb.mxu3 %v1590_v36  ;;  %1988 = vrcp.f32 %v2342_v5  ;;  %v1791_v36 = vld [vmem:[#allocation19 + $0xd8] sm:$0xff]  ;;  %v1765_v54 = vld [vmem:[#allocation19 + $0x8] sm:$0xff] }
 0xf42   :  { %1740 = vmatpush.msrb.mxu2 %v1695_v55  ;;  %1816 = vmatpush.msrb.mxu1 %v1795_v10  ;;  %v1764_v55 = vld [vmem:[#allocation19] sm:$0xff] }
 0xf43   :  { %vm1570_vm13 = vcmp.lt.s32.totalorder %v1568_v13, %v1569_v12  ;;  %1796 = vmatpush.msra.mxu3 %v1779_v6 }
 0xf44   :  { %v1571_v18 = vsel %vm1570_vm13, %v1568_v13, %v1569_v12  ;;  %1741 = vmatpush.msrb.mxu2 %v1693_v58  ;;  %v1777_v13 = vld [vmem:[#allocation19 + $0x68] sm:$0xff]  ;;  %1817 = vmatpush.msrb.mxu1 %v1794_v17  ;;  %v1782_v58 = vld [vmem:[#allocation19 + $0x90] sm:$0xff] }
 0xf45   :  { %v1572_v19 = vadd.s32 192, %v1571_v18  ;;  %1797 = vmatpush.msra.mxu3 %v1778_v9  ;;  %v1793_v12 = vld [vmem:[#allocation19 + $0xe8] sm:$0xff]  ;;  %v1776_v18 = vld [vmem:[#allocation19 + $0x60] sm:$0xff] }
 0xf46   :  { %1742 = vmatpush.msrb.mxu2 %v1691_v60  ;;  %1818 = vmatpush.msrb.mxu1 %v1793_v12  ;;  %v1780_v60 = vld [vmem:[#allocation19 + $0x80] sm:$0xff] }
 0xf47   :  { %1574 = vperm.xlu2 %1977, %v1572_v19   ;;  %1798 = vmatpush.msra.mxu3 %v1777_v13  ;;  %v1792_v19 = vld [vmem:[#allocation19 + $0xe0] sm:$0xff]  ;;  %v1989_v20 = vpop.eup %1988 }
 0xf48   :  { %1743 = vmatpush.msrb.mxu2 %v1689_v53  ;;  %1819 = vmatpush.msrb.mxu1 %v1792_v19  ;;  %v1671_v31 = vmul.f32 4.0, %v1989_v20  ;;  %vm1675_vm10 = vweird.f32 %v1989_v20 }
 0xf49   :  { %1799 = vmatpush.msra.mxu3 %v1776_v18 }
 0xf4a   :  { %1744 = vmatpush.msrb.mxu2 %v1687_v0  ;;  %1820 = vmatpush.msrb.mxu1 %v1791_v36  ;;  %v1672_v28 = vsub.f32 1.0, %v1671_v31 }
 0xf4b   :  { %1800 = vmatpush.msra.mxu3 %v1775_v26 }
 0xf4c   :  { %1745 = vmatpush.msrb.mxu2 %v1685_v1  ;;  %1821 = vmatpush.msrb.mxu1 %v1790_v29  ;;  %v1673_v48 = vmul.f32 %v1989_v20, %v1672_v28 }
 0xf4d   :  { %1801 = vmatpush.msra.mxu3 %v1774_v38 }
 0xf4e   :  { %1746 = vmatpush.msrb.mxu2 %v1683_v11  ;;  %1822 = vmatpush.msrb.mxu1 %v1789_v37 }
 0xf4f   :  { %1802 = vmatpush.msra.mxu3 %v1773_v62 }
 0xf50   :  { %1747 = vmatpush.msrb.mxu2 %v1681_v4  ;;  %1823 = vmatpush.msrb.mxu1 %v1788_v42 }
 0xf51   :  { %1803 = vmatpush.msra.mxu3 %v1772_v33 }
 0xf52   :  { %1824 = vmatpush.msrb.mxu1 %v1787_v46 }
 0xf53   :  { %1804 = vmatpush.msra.mxu3 %v1771_v43 }
 0xfa1   :  { %v1575_v30 = vpop.permute.xlu2 %1574 }
 0xfa2   :  { %vm1576_vm7 = vcmp.eq.s32.totalorder %v2530_v34, %v1575_v30  ;;  %vm1577_vm8 = vcmp.eq.s32.totalorder %v637_v8, %v1575_v30  ;;  %v1698_v34 = vld [vmem:[#allocation17 + $0x90] sm:$0xff] }
 0xfa3   :  { %v1908_v22 = vsel %vm1576_vm7, 1.0, %v2341_v15  ;;  %v1909_v25 = vsel %vm1577_vm8, 1.0, %v2341_v15  ;;  %1718 = vmatpush.msra.mxu0 %v1698_v34  ;;  %v1696_v15 = vld [vmem:[#allocation17 + $0x80] sm:$0xff]  ;;  %v1770_v30 = vld [vmem:[#allocation19 + $0x30] sm:$0xff] }
 0xfa4   :  { %v1588_v49 = vsel %vm1587_vm5, %v1585_v14, %v1908_v22  ;;  %v1589_v52 = vsel %vm1587_vm5, %v1586_v23, %v1909_v25  ;;  %v1769_v14 = vld [vmem:[#allocation19 + $0x28] sm:$0xff]  ;;  %1805 = vmatpush.msra.mxu3 %v1770_v30  ;;  %v1768_v22 = vld [vmem:[#allocation19 + $0x20] sm:$0xff]  ;;  %v1674_v25 = vadd.f32 %v1989_v20, %v1673_v48  ;;  %v1786_v34 = vld [vmem:[#allocation19 + $0xb0] sm:$0xff] }
 0xfa5   :  { %1638 = vmatmul.f32.vlgmr.msrb.gmra.mxu3 %v1588_v49  ;;  %1658 = vmatmul.f32.vlgmr.msra.gmra.mxu1 %v1589_v52 }
 0xfa6   :  { %1719 = vmatpush.msra.mxu0 %v1696_v15  ;;  %1806 = vmatpush.msra.mxu3 %v1769_v14  ;;  %v1676_v32 = vsel %vm1675_vm10, %v1989_v20, %v1674_v25  ;;  %v1785_v15 = vld [vmem:[#allocation19 + $0xa8] sm:$0xff] }
 0xfa7   :  { %1825 = vmatpush.msrb.mxu1 %v1786_v34 }
 0xfa8   :  { %1720 = vmatpush.msra.mxu0 %v1694_v56  ;;  %1807 = vmatpush.msra.mxu3 %v1768_v22  ;;  %v1784_v56 = vld [vmem:[#allocation19 + $0xa0] sm:$0xff] }
 0xfa9   :  { %1826 = vmatpush.msrb.mxu1 %v1785_v15 }
 0xfaa   :  { %1721 = vmatpush.msra.mxu0 %v1692_v57  ;;  %1808 = vmatpush.msra.mxu3 %v1767_v50  ;;  %v1783_v57 = vld [vmem:[#allocation19 + $0x98] sm:$0xff] }
 0xfab   :  { %1827 = vmatpush.msrb.mxu1 %v1784_v56 }
 0xfac   :  { %1722 = vmatpush.msra.mxu0 %v1690_v59  ;;  %1809 = vmatpush.msra.mxu3 %v1766_v51  ;;  %v1781_v59 = vld [vmem:[#allocation19 + $0x88] sm:$0xff] }
 0xfad   :  { %1828 = vmatpush.msrb.mxu1 %v1783_v57 }
 0xfae   :  { %1723 = vmatpush.msra.mxu0 %v1688_v61  ;;  %1810 = vmatpush.msra.mxu3 %v1765_v54 }
 0xfaf   :  { %1829 = vmatpush.msrb.mxu1 %v1782_v58 }
 0xfb0   :  { %1724 = vmatpush.msra.mxu0 %v1686_v63  ;;  %1811 = vmatpush.msra.mxu3 %v1764_v55 }
 0xfb1   :  { %1830 = vmatpush.msrb.mxu1 %v1781_v59 }
 0xfb2   :  { %1725 = vmatpush.msra.mxu0 %v1684_v41 }
 0xfb3   :  { %1831 = vmatpush.msrb.mxu1 %v1780_v60 }
 0xfb4   :  { %1726 = vmatpush.msra.mxu0 %v1682_v2 }
 0xfb6   :  { %1727 = vmatpush.msra.mxu0 %v1680_v3 }
0x1022   :  { %v1659_v39 = vpop.f32.mrf.mxu1 }
0x1028   :  { %v1639_v40 = vpop.f32.mrf.mxu3 }
0x1029   :  { %v1660_v8 = vadd.f32 %v1659_v39, %v1639_v40 }
0x102b   :  { %v1663_v45 = vsel %vm1662_vm9, %v1660_v8, 0.0 }
0x102c   :  { %v1664_v47 = vrot.slane %v1663_v45, 4 }
0x102e   :  { %v1665_v21 = vadd.f32 %v1664_v47, %v1663_v45 }
0x1030   :  { %v1666_v23 = vrot.slane %v1665_v21, 2 }
0x1032   :  { %v1667_v49 = vadd.f32 %v1666_v23, %v1665_v21 }
0x1034   :  { %v1668_v52 = vrot.slane %v1667_v49, 1 }
0x1036   :  { %v1669_v27 = vadd.f32 %v1668_v52, %v1667_v49 }
0x1038   :  { %v1677_v16 = vmul.f32 %v1676_v32, %v1669_v27 }
0x103a   :  { %v1679_v44 = vadd.f32 %v1678_v35, %v1677_v16 }
0x103c   :  { %1728 = vmatmul.f32.vlgmr.msra.gmra.mxu0 %v1679_v44  ;;  %1748 = vmatmul.f32.vlgmr.msrb.gmra.mxu2 %v1679_v44 }
0x10b9   :  { %v1729_v61 = vpop.f32.mrf.mxu0 }
0x10ba   :  { %1990 = vtanh.f32 %v1729_v61 }
0x10bf   :  { %v1749_v53 = vpop.f32.mrf.mxu2 }
0x10c0   :  { %v1991_v63 = vpop.eup %1990  ;;  %1992 = vtanh.f32 %v1749_v53 }
0x10c1   :  { %1812 = vmatmul.f32.vlgmr.msra.gmra.mxu3 %v1991_v63 }
0x10c6   :  { %v1993_v0 = vpop.eup %1992 }
0x10c7   :  { %v1756_v41 = vrot.slane %v1993_v0, 7  ;;  %1832 = vmatmul.f32.vlgmr.msrb.gmra.mxu1 %v1993_v0 }
0x10c9   :  { %v1757_v1 = vsel %vm619_vm2, %v1991_v63, %v1756_v41 }
0x10ca   :  { %1763 = vst.msk [vmem:[#allocation20] sm:$0x3] %vm1761_vm6, %v1757_v1 }
0x10cb   :  { %1868 = dma.vmem_to_hbm [thread:$0]  %s1864_s26, 32, %s1866_s30, [#allocation4]  }
0x1144   :  { %v1813_v2 = vpop.f32.mrf.mxu3  ;;  %v1833_v11 = vpop.f32.mrf.mxu1 }
0x1145   :  { %v1834_v3 = vadd.f32 %v1833_v11, %v1813_v2 }
0x1147   :  { %v1836_v4 = vmul.f32 %v1834_v3, %v1834_v3 }
0x1149   :  { %v1837_v5 = vsel %vm619_vm2, %v1836_v4, 0.0 }
0x114a   :  { %1838 = vadd.xlane.f32.xlu1 %v1837_v5 }
0x11bd   :  { %v1839_v6 = vpop.xlane.xlu1 %1838 }
0x11be   :  { %v1840_v9 = vadd.f32 1e-12, %v1839_v6 }
0x11c0   :  { %1994 = vrsqrt.f32 %v1840_v9  ;;  %vm1847_vm12 = vweird.f32 %v1840_v9 }
0x11c6   :  { %v1995_v10 = vpop.eup %1994 }
0x11c7   :  { %v1842_v13 = vmul.f32 %v1995_v10, %v1840_v9  ;;  %vm1848_vm11 = vweird.f32 %v1995_v10 }
0x11c8   :  { %vm1849_vm13 = vmor %vm1847_vm12, %vm1848_vm11 }
0x11c9   :  { %v1843_v17 = vmul.f32 %v1995_v10, %v1842_v13 }
0x11cb   :  { %v1844_v7 = vmul.f32 0.5, %v1843_v17 }
0x11cd   :  { %v1845_v12 = vsub.f32 1.5, %v1844_v7 }
0x11cf   :  { %v1846_v18 = vmul.f32 %v1995_v10, %v1845_v12 }
0x11d1   :  { %v1850_v19 = vsel %vm1849_vm13, %v1995_v10, %v1846_v18 }
0x11d2   :  { %v1851_v20 = vmul.f32 %v1850_v19, %v1834_v3 }
0x11d4   :  { %v1852_v26 = vmul.f32 %v1851_v20, %v2505_v24 }
0x11d6   :  { %v1853_v36 = vsel %vm619_vm2, %v1852_v26, 0.0 }
0x11d7   :  { %1854 = vadd.xlane.f32.xlu2 %v1853_v36 }
0x124a   :  { %v1855_v38 = vpop.xlane.xlu2 %1854 }
0x124b   :  { %1857 = vst.msk [vmem:[#allocation21] sm:$0x1] %vm1856_vm14, %v1855_v38 }
0x124c   :  { %1879 = dma.vmem_to_hbm [thread:$0]  %s1875_s15, 16, %s1877_s16, [#allocation22]  }
0x124d   :  { %2320 = dma.done.wait [#allocation4], 32  }
0x124e   :  { %2321 = vsyncadd [#allocation4], 4294967264 }
0x124f   :  { %2322 = dma.done.wait [#allocation22], 16  }
0x1250   :  { %2323 = vsyncadd [#allocation22], 4294967280 }
0x1251   :  { %1888 = vsyncpa [#allocation3], 1 }
0x1252   :  { %1889 = vsyncpa [#allocation6], 1 }
0x1253   :  { %1890 = vsyncpa [#allocation9], 1 }
0x1254   :  { %1891 = vsyncpa [#allocation12], 1 }
0x1255   :  { %1892 = vsyncpa [#allocation15], 1 }
0x1256   :  { %1893 = vsyncpa [#allocation18], 1 }
0x1257   :  { %1894 = vsyncpa [#allocation4], 1 }
0x1258   :  { %1895 = vsyncpa [#allocation22], 1 }

</bundles_post_ra>
